<compile_context>
chip_gen: v6e
topology: v6e:2x2x1
jax: 0.10.0
libtpu: 0.0.40
codegen_flags: <defaults>
</compile_context>

<pallas_src>
import jax
import jax.numpy as jnp
from jax.experimental import pallas as pl
from jax.experimental.pallas import tpu as pltpu

# ---- synthetic config (stands in for Config / Vocabulary) ----
VOCAB_SIZE = 64
EMBEDDING_DIM = 16
HIDDEN_DIM = 32
MAX_SENTENCE_LENGTH = 8

LANES = 128
VOCAB_PAD = ((VOCAB_SIZE + LANES - 1) // LANES) * LANES  # lane-dense head width
NEG_PAD = -1.0e9                                         # bias for padded vocab cols


# ------------------------- fused forward kernel -------------------------
def insert_front_kernel(sent_ref, pos_ref, len_ref,
                        emb_ref, wih_ref, whh_ref,
                        b_rz_ref, b_in_ref, b_hn_ref,
                        wd_ref, bd_ref,
                        logits_ref, prob_ref, sent_out_ref, len_out_ref):
    B, S = sent_ref.shape
    V = emb_ref.shape[0]
    H = whh_ref.shape[0]
    VP = wd_ref.shape[1]

    sent = sent_ref[...]                 # [B, S] int32
    pos = pos_ref[...]                   # [B, 1] int32

    # Hoisted input projection: token id -> GRU input gates, one MXU pass.
    # gi(token v) = (one_hot(v) @ (emb @ wih)) ; emb @ wih computed once.
    w_tok = jnp.dot(emb_ref[...], wih_ref[...],
                    preferred_element_type=jnp.float32)          # [V, 3H]
    whh = whh_ref[...]                                           # [H, 3H]
    b_rz = b_rz_ref[...]                                         # [1, 2H]
    b_in = b_in_ref[...]                                         # [1, H]
    b_hn = b_hn_ref[...]                                         # [1, H]

    vocab_iota = jax.lax.broadcasted_iota(jnp.int32, (B, V), 1)  # [B, V]

    h = jnp.zeros((B, H), jnp.float32)
    hpos = jnp.zeros((B, H), jnp.float32)

    # Fully-unrolled time loop (S is small & static) so the scheduler can
    # overlap the EUP sigmoid/tanh with the next step's whh matmul.
    for t in range(S):
        tok_t = sent[:, t:t + 1]                                  # [B, 1]
        oh = (vocab_iota == tok_t).astype(jnp.float32)            # [B, V]
        gi = jnp.dot(oh, w_tok, preferred_element_type=jnp.float32)   # [B, 3H]
        gh = jnp.dot(h, whh, preferred_element_type=jnp.float32)      # [B, 3H]
        rz = jax.nn.sigmoid(gi[:, :2 * H] + gh[:, :2 * H] + b_rz)     # [B, 2H]
        r = rz[:, :H]
        z = rz[:, H:]
        n = jnp.tanh(gi[:, 2 * H:] + b_in + r * (gh[:, 2 * H:] + b_hn))
        h = (1.0 - z) * n + z * h
        # Capture the hidden state at t == position[b]; no [S,B,H] writeback.
        hpos = jnp.where(pos == t, h, hpos)

    # Dense head (vocab padded to a lane-dense multiple of 128).
    logits = jnp.dot(hpos, wd_ref[...],
                     preferred_element_type=jnp.float32) + bd_ref[...]   # [B, VP]
    logits_ref[...] = logits

    # Softmax -> max prob.
    m = jnp.max(logits, axis=1, keepdims=True)
    e = jnp.exp(logits - m)
    denom = jnp.sum(e, axis=1, keepdims=True)
    probs = e / denom
    prob_ref[...] = jnp.max(probs, axis=1, keepdims=True)

    # Argmax on logits (first index on ties, like torch.max); padded cols are -1e9.
    col = jax.lax.broadcasted_iota(jnp.int32, logits.shape, 1)
    lmax = jnp.max(logits, axis=1, keepdims=True)
    idx = jnp.min(jnp.where(logits >= lmax, col, VP), axis=1, keepdims=True)  # [B,1]

    # Insert idx at position pos: out[j<pos]=s[j]; out[pos]=idx; out[j>pos]=s[j-1].
    # (concat of two static lane-slices on a single-vreg slab; pltpu.roll would
    #  lower to essentially the same handful of ops at this size)
    j = jax.lax.broadcasted_iota(jnp.int32, sent.shape, 1)
    shifted = jnp.concatenate([sent[:, :1], sent[:, :-1]], axis=1)
    sent_out_ref[...] = jnp.where(j < pos, sent,
                                  jnp.where(j == pos, idx, shifted))

    ln = len_ref[...]                                             # [B, 1]
    len_out_ref[...] = jnp.where(ln < MAX_SENTENCE_LENGTH, ln + 1, ln)


# ------------------------- wrapper -------------------------
def insert_front_forward(params, sentences, position, length):
    B, S = sentences.shape
    H = HIDDEN_DIM
    V = VOCAB_SIZE
    pad = VOCAB_PAD - V

    # Parameter prep (constants; folded r/z biases, lane-dense padded head).
    bih, bhh = params["bih"], params["bhh"]
    b_rz = bih[:, :2 * H] + bhh[:, :2 * H]          # [1, 2H]
    b_in = bih[:, 2 * H:]                           # [1, H]
    b_hn = bhh[:, 2 * H:]                           # [1, H]
    wd_pad = jnp.pad(params["wd_t"], ((0, 0), (0, pad)))
    bd_pad = jnp.pad(params["bd"], ((0, 0), (0, pad)), constant_values=NEG_PAD)

    vmem = pl.BlockSpec(memory_space=pltpu.MemorySpace.VMEM)
    logits_pad, maxp, sent_ins, len_ins = pl.pallas_call(
        insert_front_kernel,
        out_shape=(
            jax.ShapeDtypeStruct((B, VOCAB_PAD), jnp.float32),
            jax.ShapeDtypeStruct((B, 1), jnp.float32),
            jax.ShapeDtypeStruct((B, S), jnp.int32),
            jax.ShapeDtypeStruct((B, 1), jnp.int32),
        ),
        in_specs=[vmem] * 11,
        out_specs=(vmem, vmem, vmem, vmem),
    )(sentences.astype(jnp.int32),
      position.reshape(B, 1).astype(jnp.int32),
      length.reshape(B, 1).astype(jnp.int32),
      params["embedding"], params["wih_t"], params["whh_t"],
      b_rz, b_in, b_hn, wd_pad, bd_pad)

    # matches torch return: (logits[B,V], decision_probs[B], sentences_inserted[B,S], length_inserted[B])
    return logits_pad[:, :V], maxp[:, 0], sent_ins, len_ins[:, 0]


# ------------------------- pure-JAX reference -------------------------
def reference(params, sentences, position, length):
    H = HIDDEN_DIM
    emb = params["embedding"][sentences]

    def step(h, xt):
        gi = xt @ params["wih_t"] + params["bih"]
        gh = h @ params["whh_t"] + params["bhh"]
        r = jax.nn.sigmoid(gi[:, :H] + gh[:, :H])
        z = jax.nn.sigmoid(gi[:, H:2 * H] + gh[:, H:2 * H])
        n = jnp.tanh(gi[:, 2 * H:] + r * gh[:, 2 * H:])
        h = (1.0 - z) * n + z * h
        return h, h

    h0 = jnp.zeros((sentences.shape[0], H), jnp.float32)
    _, outs = jax.lax.scan(step, h0, jnp.transpose(emb, (1, 0, 2)))
    out = jnp.transpose(outs, (1, 0, 2))
    hpos = jnp.take_along_axis(out, position[:, None, None], axis=1)[:, 0, :]
    logits = hpos @ params["wd_t"] + params["bd"]
    probs = jax.nn.softmax(logits, axis=1)
    maxp = jnp.max(probs, axis=1)
    idx = jnp.argmax(probs, axis=1).astype(jnp.int32)
    B, S = sentences.shape
    j = jnp.arange(S)[None, :]
    shifted = jnp.concatenate([sentences[:, :1], sentences[:, :-1]], axis=1)
    sent_ins = jnp.where(j < position[:, None], sentences,
                         jnp.where(j == position[:, None], idx[:, None], shifted))
    len_ins = jnp.where(length < MAX_SENTENCE_LENGTH, length + 1, length)
    return logits, maxp, sent_ins, len_ins


if __name__ == "__main__":
    key = jax.random.PRNGKey(0)
    ks = jax.random.split(key, 10)
    B, S = 2, 8

    params = {
        "embedding": 0.1 * jax.random.normal(ks[0], (VOCAB_SIZE, EMBEDDING_DIM), jnp.float32),
        "wih_t": 0.1 * jax.random.normal(ks[1], (EMBEDDING_DIM, 3 * HIDDEN_DIM), jnp.float32),
        "whh_t": 0.1 * jax.random.normal(ks[2], (HIDDEN_DIM, 3 * HIDDEN_DIM), jnp.float32),
        "bih": 0.1 * jax.random.normal(ks[3], (1, 3 * HIDDEN_DIM), jnp.float32),
        "bhh": 0.1 * jax.random.normal(ks[4], (1, 3 * HIDDEN_DIM), jnp.float32),
        "wd_t": 0.1 * jax.random.normal(ks[5], (HIDDEN_DIM, VOCAB_SIZE), jnp.float32),
        "bd": 0.1 * jax.random.normal(ks[6], (1, VOCAB_SIZE), jnp.float32),
    }
    sentences = jax.random.randint(ks[7], (B, S), 0, VOCAB_SIZE, jnp.int32)
    position = jax.random.randint(ks[8], (B,), 0, S, jnp.int32)
    length = jax.random.randint(ks[9], (B,), 1, S + 1, jnp.int32)

    logits, maxp, sent_ins, len_ins = jax.block_until_ready(
        insert_front_forward(params, sentences, position, length))

    r_logits, r_maxp, r_sent, r_len = reference(params, sentences, position, length)
    assert jnp.allclose(logits, r_logits, atol=1e-4), "logits mismatch"
    assert jnp.allclose(maxp, r_maxp, atol=1e-5), "prob mismatch"
    assert jnp.array_equal(sent_ins, r_sent), "inserted sentences mismatch"
    assert jnp.array_equal(len_ins, r_len.astype(len_ins.dtype)), "length mismatch"

    print("KERNEL_OK")
</pallas_src>

<mosaic_0001>
module attributes {stable_mosaic.version = 11 : i64} {
  func.func @insert_front_kernel(%arg0: memref<2x8xi32, #tpu.memory_space<vmem>>, %arg1: memref<2x1xi32, #tpu.memory_space<vmem>>, %arg2: memref<2x1xi32, #tpu.memory_space<vmem>>, %arg3: memref<64x16xf32, #tpu.memory_space<vmem>>, %arg4: memref<16x96xf32, #tpu.memory_space<vmem>>, %arg5: memref<32x96xf32, #tpu.memory_space<vmem>>, %arg6: memref<1x64xf32, #tpu.memory_space<vmem>>, %arg7: memref<1x32xf32, #tpu.memory_space<vmem>>, %arg8: memref<1x32xf32, #tpu.memory_space<vmem>>, %arg9: memref<32x128xf32, #tpu.memory_space<vmem>>, %arg10: memref<1x128xf32, #tpu.memory_space<vmem>>, %arg11: memref<2x128xf32, #tpu.memory_space<vmem>>, %arg12: memref<2x1xf32, #tpu.memory_space<vmem>>, %arg13: memref<2x8xi32, #tpu.memory_space<vmem>>, %arg14: memref<2x1xi32, #tpu.memory_space<vmem>>) attributes {dimension_semantics = [], scalar_prefetch = 0 : i64, scratch_operands = 0 : i64, tpu.core_type = #tpu.core_type<tc>} {
    %c0 = arith.constant 0 : index
    %c0_0 = arith.constant 0 : index
    %0 = vector.load %arg0[%c0, %c0_0] : memref<2x8xi32, #tpu.memory_space<vmem>>, vector<2x8xi32>
    %c0_1 = arith.constant 0 : index
    %c0_2 = arith.constant 0 : index
    %1 = vector.load %arg1[%c0_1, %c0_2] : memref<2x1xi32, #tpu.memory_space<vmem>>, vector<2x1xi32>
    %c0_3 = arith.constant 0 : index
    %c0_4 = arith.constant 0 : index
    %2 = vector.load %arg3[%c0_3, %c0_4] : memref<64x16xf32, #tpu.memory_space<vmem>>, vector<64x16xf32>
    %c0_5 = arith.constant 0 : index
    %c0_6 = arith.constant 0 : index
    %3 = vector.load %arg4[%c0_5, %c0_6] : memref<16x96xf32, #tpu.memory_space<vmem>>, vector<16x96xf32>
    %cst = arith.constant dense<0.000000e+00> : vector<64x96xf32>
    %4 = tpu.matmul %2, %3, %cst {dimension_numbers = #tpu.dot_dimension_numbers<[1], [0], [0], [1], [0, 0, 1, 1], [], []>} : vector<64x16xf32>, vector<16x96xf32>, vector<64x96xf32> -> vector<64x96xf32>
    %c0_7 = arith.constant 0 : index
    %c0_8 = arith.constant 0 : index
    %5 = vector.load %arg5[%c0_7, %c0_8] : memref<32x96xf32, #tpu.memory_space<vmem>>, vector<32x96xf32>
    %c0_9 = arith.constant 0 : index
    %c0_10 = arith.constant 0 : index
    %6 = vector.load %arg6[%c0_9, %c0_10] : memref<1x64xf32, #tpu.memory_space<vmem>>, vector<1x64xf32>
    %c0_11 = arith.constant 0 : index
    %c0_12 = arith.constant 0 : index
    %7 = vector.load %arg7[%c0_11, %c0_12] : memref<1x32xf32, #tpu.memory_space<vmem>>, vector<1x32xf32>
    %c0_13 = arith.constant 0 : index
    %c0_14 = arith.constant 0 : index
    %8 = vector.load %arg8[%c0_13, %c0_14] : memref<1x32xf32, #tpu.memory_space<vmem>>, vector<1x32xf32>
    %9 = tpu.iota {dimensions = array<i32: 1>} : vector<2x64xi32>
    %cst_15 = arith.constant 0.000000e+00 : f32
    %10 = vector.broadcast %cst_15 : f32 to vector<2x32xf32>
    %cst_16 = arith.constant 0.000000e+00 : f32
    %11 = vector.broadcast %cst_16 : f32 to vector<2x32xf32>
    %12 = vector.extract_strided_slice %0 {offsets = [0, 0], sizes = [2, 1], strides = [1, 1]} : vector<2x8xi32> to vector<2x1xi32>
    %13 = vector.broadcast %12 : vector<2x1xi32> to vector<2x64xi32>
    %14 = arith.cmpi eq, %9, %13 : vector<2x64xi32>
    %15 = arith.extui %14 : vector<2x64xi1> to vector<2x64xi32>
    %16 = arith.sitofp %15 : vector<2x64xi32> to vector<2x64xf32>
    %cst_17 = arith.constant dense<0.000000e+00> : vector<2x96xf32>
    %17 = tpu.matmul %16, %4, %cst_17 {dimension_numbers = #tpu.dot_dimension_numbers<[1], [0], [0], [1], [0, 0, 1, 1], [], []>} : vector<2x64xf32>, vector<64x96xf32>, vector<2x96xf32> -> vector<2x96xf32>
    %cst_18 = arith.constant dense<0.000000e+00> : vector<2x96xf32>
    %18 = tpu.matmul %10, %5, %cst_18 {dimension_numbers = #tpu.dot_dimension_numbers<[1], [0], [0], [1], [0, 0, 1, 1], [], []>} : vector<2x32xf32>, vector<32x96xf32>, vector<2x96xf32> -> vector<2x96xf32>
    %19 = vector.extract_strided_slice %17 {offsets = [0, 0], sizes = [2, 64], strides = [1, 1]} : vector<2x96xf32> to vector<2x64xf32>
    %20 = vector.extract_strided_slice %18 {offsets = [0, 0], sizes = [2, 64], strides = [1, 1]} : vector<2x96xf32> to vector<2x64xf32>
    %21 = arith.addf %19, %20 : vector<2x64xf32>
    %22 = vector.broadcast %6 : vector<1x64xf32> to vector<2x64xf32>
    %23 = arith.addf %21, %22 : vector<2x64xf32>
    %24 = arith.negf %23 : vector<2x64xf32>
    %25 = math.exp %24 : vector<2x64xf32>
    %cst_19 = arith.constant 1.000000e+00 : f32
    %26 = vector.broadcast %cst_19 : f32 to vector<2x64xf32>
    %27 = arith.addf %26, %25 : vector<2x64xf32>
    %28 = arith.divf %26, %27 : vector<2x64xf32>
    %29 = vector.extract_strided_slice %28 {offsets = [0, 0], sizes = [2, 32], strides = [1, 1]} : vector<2x64xf32> to vector<2x32xf32>
    %30 = vector.extract_strided_slice %28 {offsets = [0, 32], sizes = [2, 32], strides = [1, 1]} : vector<2x64xf32> to vector<2x32xf32>
    %31 = vector.extract_strided_slice %17 {offsets = [0, 64], sizes = [2, 32], strides = [1, 1]} : vector<2x96xf32> to vector<2x32xf32>
    %32 = vector.broadcast %7 : vector<1x32xf32> to vector<2x32xf32>
    %33 = arith.addf %31, %32 : vector<2x32xf32>
    %34 = vector.extract_strided_slice %18 {offsets = [0, 64], sizes = [2, 32], strides = [1, 1]} : vector<2x96xf32> to vector<2x32xf32>
    %35 = vector.broadcast %8 : vector<1x32xf32> to vector<2x32xf32>
    %36 = arith.addf %34, %35 : vector<2x32xf32>
    %37 = arith.mulf %29, %36 : vector<2x32xf32>
    %38 = arith.addf %33, %37 : vector<2x32xf32>
    %39 = math.tanh %38 : vector<2x32xf32>
    %cst_20 = arith.constant 1.000000e+00 : f32
    %40 = vector.broadcast %cst_20 : f32 to vector<2x32xf32>
    %41 = arith.subf %40, %30 : vector<2x32xf32>
    %42 = arith.mulf %41, %39 : vector<2x32xf32>
    %43 = arith.mulf %30, %10 : vector<2x32xf32>
    %44 = arith.addf %42, %43 : vector<2x32xf32>
    %c0_i32 = arith.constant 0 : i32
    %45 = vector.broadcast %c0_i32 : i32 to vector<2x1xi32>
    %46 = arith.cmpi eq, %1, %45 : vector<2x1xi32>
    %47 = vector.shape_cast %46 : vector<2x1xi1> to vector<2x1xi1>
    %48 = vector.broadcast %47 : vector<2x1xi1> to vector<2x32xi1>
    %49 = arith.select %48, %44, %11 : vector<2x32xi1>, vector<2x32xf32>
    %50 = vector.extract_strided_slice %0 {offsets = [0, 1], sizes = [2, 1], strides = [1, 1]} : vector<2x8xi32> to vector<2x1xi32>
    %51 = vector.broadcast %50 : vector<2x1xi32> to vector<2x64xi32>
    %52 = arith.cmpi eq, %9, %51 : vector<2x64xi32>
    %53 = arith.extui %52 : vector<2x64xi1> to vector<2x64xi32>
    %54 = arith.sitofp %53 : vector<2x64xi32> to vector<2x64xf32>
    %cst_21 = arith.constant dense<0.000000e+00> : vector<2x96xf32>
    %55 = tpu.matmul %54, %4, %cst_21 {dimension_numbers = #tpu.dot_dimension_numbers<[1], [0], [0], [1], [0, 0, 1, 1], [], []>} : vector<2x64xf32>, vector<64x96xf32>, vector<2x96xf32> -> vector<2x96xf32>
    %cst_22 = arith.constant dense<0.000000e+00> : vector<2x96xf32>
    %56 = tpu.matmul %44, %5, %cst_22 {dimension_numbers = #tpu.dot_dimension_numbers<[1], [0], [0], [1], [0, 0, 1, 1], [], []>} : vector<2x32xf32>, vector<32x96xf32>, vector<2x96xf32> -> vector<2x96xf32>
    %57 = vector.extract_strided_slice %55 {offsets = [0, 0], sizes = [2, 64], strides = [1, 1]} : vector<2x96xf32> to vector<2x64xf32>
    %58 = vector.extract_strided_slice %56 {offsets = [0, 0], sizes = [2, 64], strides = [1, 1]} : vector<2x96xf32> to vector<2x64xf32>
    %59 = arith.addf %57, %58 : vector<2x64xf32>
    %60 = vector.broadcast %6 : vector<1x64xf32> to vector<2x64xf32>
    %61 = arith.addf %59, %60 : vector<2x64xf32>
    %62 = arith.negf %61 : vector<2x64xf32>
    %63 = math.exp %62 : vector<2x64xf32>
    %cst_23 = arith.constant 1.000000e+00 : f32
    %64 = vector.broadcast %cst_23 : f32 to vector<2x64xf32>
    %65 = arith.addf %64, %63 : vector<2x64xf32>
    %66 = arith.divf %64, %65 : vector<2x64xf32>
    %67 = vector.extract_strided_slice %66 {offsets = [0, 0], sizes = [2, 32], strides = [1, 1]} : vector<2x64xf32> to vector<2x32xf32>
    %68 = vector.extract_strided_slice %66 {offsets = [0, 32], sizes = [2, 32], strides = [1, 1]} : vector<2x64xf32> to vector<2x32xf32>
    %69 = vector.extract_strided_slice %55 {offsets = [0, 64], sizes = [2, 32], strides = [1, 1]} : vector<2x96xf32> to vector<2x32xf32>
    %70 = vector.broadcast %7 : vector<1x32xf32> to vector<2x32xf32>
    %71 = arith.addf %69, %70 : vector<2x32xf32>
    %72 = vector.extract_strided_slice %56 {offsets = [0, 64], sizes = [2, 32], strides = [1, 1]} : vector<2x96xf32> to vector<2x32xf32>
    %73 = vector.broadcast %8 : vector<1x32xf32> to vector<2x32xf32>
    %74 = arith.addf %72, %73 : vector<2x32xf32>
    %75 = arith.mulf %67, %74 : vector<2x32xf32>
    %76 = arith.addf %71, %75 : vector<2x32xf32>
    %77 = math.tanh %76 : vector<2x32xf32>
    %cst_24 = arith.constant 1.000000e+00 : f32
    %78 = vector.broadcast %cst_24 : f32 to vector<2x32xf32>
    %79 = arith.subf %78, %68 : vector<2x32xf32>
    %80 = arith.mulf %79, %77 : vector<2x32xf32>
    %81 = arith.mulf %68, %44 : vector<2x32xf32>
    %82 = arith.addf %80, %81 : vector<2x32xf32>
    %c1_i32 = arith.constant 1 : i32
    %83 = vector.broadcast %c1_i32 : i32 to vector<2x1xi32>
    %84 = arith.cmpi eq, %1, %83 : vector<2x1xi32>
    %85 = vector.shape_cast %84 : vector<2x1xi1> to vector<2x1xi1>
    %86 = vector.broadcast %85 : vector<2x1xi1> to vector<2x32xi1>
    %87 = arith.select %86, %82, %49 : vector<2x32xi1>, vector<2x32xf32>
    %88 = vector.extract_strided_slice %0 {offsets = [0, 2], sizes = [2, 1], strides = [1, 1]} : vector<2x8xi32> to vector<2x1xi32>
    %89 = vector.broadcast %88 : vector<2x1xi32> to vector<2x64xi32>
    %90 = arith.cmpi eq, %9, %89 : vector<2x64xi32>
    %91 = arith.extui %90 : vector<2x64xi1> to vector<2x64xi32>
    %92 = arith.sitofp %91 : vector<2x64xi32> to vector<2x64xf32>
    %cst_25 = arith.constant dense<0.000000e+00> : vector<2x96xf32>
    %93 = tpu.matmul %92, %4, %cst_25 {dimension_numbers = #tpu.dot_dimension_numbers<[1], [0], [0], [1], [0, 0, 1, 1], [], []>} : vector<2x64xf32>, vector<64x96xf32>, vector<2x96xf32> -> vector<2x96xf32>
    %cst_26 = arith.constant dense<0.000000e+00> : vector<2x96xf32>
    %94 = tpu.matmul %82, %5, %cst_26 {dimension_numbers = #tpu.dot_dimension_numbers<[1], [0], [0], [1], [0, 0, 1, 1], [], []>} : vector<2x32xf32>, vector<32x96xf32>, vector<2x96xf32> -> vector<2x96xf32>
    %95 = vector.extract_strided_slice %93 {offsets = [0, 0], sizes = [2, 64], strides = [1, 1]} : vector<2x96xf32> to vector<2x64xf32>
    %96 = vector.extract_strided_slice %94 {offsets = [0, 0], sizes = [2, 64], strides = [1, 1]} : vector<2x96xf32> to vector<2x64xf32>
    %97 = arith.addf %95, %96 : vector<2x64xf32>
    %98 = vector.broadcast %6 : vector<1x64xf32> to vector<2x64xf32>
    %99 = arith.addf %97, %98 : vector<2x64xf32>
    %100 = arith.negf %99 : vector<2x64xf32>
    %101 = math.exp %100 : vector<2x64xf32>
    %cst_27 = arith.constant 1.000000e+00 : f32
    %102 = vector.broadcast %cst_27 : f32 to vector<2x64xf32>
    %103 = arith.addf %102, %101 : vector<2x64xf32>
    %104 = arith.divf %102, %103 : vector<2x64xf32>
    %105 = vector.extract_strided_slice %104 {offsets = [0, 0], sizes = [2, 32], strides = [1, 1]} : vector<2x64xf32> to vector<2x32xf32>
    %106 = vector.extract_strided_slice %104 {offsets = [0, 32], sizes = [2, 32], strides = [1, 1]} : vector<2x64xf32> to vector<2x32xf32>
    %107 = vector.extract_strided_slice %93 {offsets = [0, 64], sizes = [2, 32], strides = [1, 1]} : vector<2x96xf32> to vector<2x32xf32>
    %108 = vector.broadcast %7 : vector<1x32xf32> to vector<2x32xf32>
    %109 = arith.addf %107, %108 : vector<2x32xf32>
    %110 = vector.extract_strided_slice %94 {offsets = [0, 64], sizes = [2, 32], strides = [1, 1]} : vector<2x96xf32> to vector<2x32xf32>
    %111 = vector.broadcast %8 : vector<1x32xf32> to vector<2x32xf32>
    %112 = arith.addf %110, %111 : vector<2x32xf32>
    %113 = arith.mulf %105, %112 : vector<2x32xf32>
    %114 = arith.addf %109, %113 : vector<2x32xf32>
    %115 = math.tanh %114 : vector<2x32xf32>
    %cst_28 = arith.constant 1.000000e+00 : f32
    %116 = vector.broadcast %cst_28 : f32 to vector<2x32xf32>
    %117 = arith.subf %116, %106 : vector<2x32xf32>
    %118 = arith.mulf %117, %115 : vector<2x32xf32>
    %119 = arith.mulf %106, %82 : vector<2x32xf32>
    %120 = arith.addf %118, %119 : vector<2x32xf32>
    %c2_i32 = arith.constant 2 : i32
    %121 = vector.broadcast %c2_i32 : i32 to vector<2x1xi32>
    %122 = arith.cmpi eq, %1, %121 : vector<2x1xi32>
    %123 = vector.shape_cast %122 : vector<2x1xi1> to vector<2x1xi1>
    %124 = vector.broadcast %123 : vector<2x1xi1> to vector<2x32xi1>
    %125 = arith.select %124, %120, %87 : vector<2x32xi1>, vector<2x32xf32>
    %126 = vector.extract_strided_slice %0 {offsets = [0, 3], sizes = [2, 1], strides = [1, 1]} : vector<2x8xi32> to vector<2x1xi32>
    %127 = vector.broadcast %126 : vector<2x1xi32> to vector<2x64xi32>
    %128 = arith.cmpi eq, %9, %127 : vector<2x64xi32>
    %129 = arith.extui %128 : vector<2x64xi1> to vector<2x64xi32>
    %130 = arith.sitofp %129 : vector<2x64xi32> to vector<2x64xf32>
    %cst_29 = arith.constant dense<0.000000e+00> : vector<2x96xf32>
    %131 = tpu.matmul %130, %4, %cst_29 {dimension_numbers = #tpu.dot_dimension_numbers<[1], [0], [0], [1], [0, 0, 1, 1], [], []>} : vector<2x64xf32>, vector<64x96xf32>, vector<2x96xf32> -> vector<2x96xf32>
    %cst_30 = arith.constant dense<0.000000e+00> : vector<2x96xf32>
    %132 = tpu.matmul %120, %5, %cst_30 {dimension_numbers = #tpu.dot_dimension_numbers<[1], [0], [0], [1], [0, 0, 1, 1], [], []>} : vector<2x32xf32>, vector<32x96xf32>, vector<2x96xf32> -> vector<2x96xf32>
    %133 = vector.extract_strided_slice %131 {offsets = [0, 0], sizes = [2, 64], strides = [1, 1]} : vector<2x96xf32> to vector<2x64xf32>
    %134 = vector.extract_strided_slice %132 {offsets = [0, 0], sizes = [2, 64], strides = [1, 1]} : vector<2x96xf32> to vector<2x64xf32>
    %135 = arith.addf %133, %134 : vector<2x64xf32>
    %136 = vector.broadcast %6 : vector<1x64xf32> to vector<2x64xf32>
    %137 = arith.addf %135, %136 : vector<2x64xf32>
    %138 = arith.negf %137 : vector<2x64xf32>
    %139 = math.exp %138 : vector<2x64xf32>
    %cst_31 = arith.constant 1.000000e+00 : f32
    %140 = vector.broadcast %cst_31 : f32 to vector<2x64xf32>
    %141 = arith.addf %140, %139 : vector<2x64xf32>
    %142 = arith.divf %140, %141 : vector<2x64xf32>
    %143 = vector.extract_strided_slice %142 {offsets = [0, 0], sizes = [2, 32], strides = [1, 1]} : vector<2x64xf32> to vector<2x32xf32>
    %144 = vector.extract_strided_slice %142 {offsets = [0, 32], sizes = [2, 32], strides = [1, 1]} : vector<2x64xf32> to vector<2x32xf32>
    %145 = vector.extract_strided_slice %131 {offsets = [0, 64], sizes = [2, 32], strides = [1, 1]} : vector<2x96xf32> to vector<2x32xf32>
    %146 = vector.broadcast %7 : vector<1x32xf32> to vector<2x32xf32>
    %147 = arith.addf %145, %146 : vector<2x32xf32>
    %148 = vector.extract_strided_slice %132 {offsets = [0, 64], sizes = [2, 32], strides = [1, 1]} : vector<2x96xf32> to vector<2x32xf32>
    %149 = vector.broadcast %8 : vector<1x32xf32> to vector<2x32xf32>
    %150 = arith.addf %148, %149 : vector<2x32xf32>
    %151 = arith.mulf %143, %150 : vector<2x32xf32>
    %152 = arith.addf %147, %151 : vector<2x32xf32>
    %153 = math.tanh %152 : vector<2x32xf32>
    %cst_32 = arith.constant 1.000000e+00 : f32
    %154 = vector.broadcast %cst_32 : f32 to vector<2x32xf32>
    %155 = arith.subf %154, %144 : vector<2x32xf32>
    %156 = arith.mulf %155, %153 : vector<2x32xf32>
    %157 = arith.mulf %144, %120 : vector<2x32xf32>
    %158 = arith.addf %156, %157 : vector<2x32xf32>
    %c3_i32 = arith.constant 3 : i32
    %159 = vector.broadcast %c3_i32 : i32 to vector<2x1xi32>
    %160 = arith.cmpi eq, %1, %159 : vector<2x1xi32>
    %161 = vector.shape_cast %160 : vector<2x1xi1> to vector<2x1xi1>
    %162 = vector.broadcast %161 : vector<2x1xi1> to vector<2x32xi1>
    %163 = arith.select %162, %158, %125 : vector<2x32xi1>, vector<2x32xf32>
    %164 = vector.extract_strided_slice %0 {offsets = [0, 4], sizes = [2, 1], strides = [1, 1]} : vector<2x8xi32> to vector<2x1xi32>
    %165 = vector.broadcast %164 : vector<2x1xi32> to vector<2x64xi32>
    %166 = arith.cmpi eq, %9, %165 : vector<2x64xi32>
    %167 = arith.extui %166 : vector<2x64xi1> to vector<2x64xi32>
    %168 = arith.sitofp %167 : vector<2x64xi32> to vector<2x64xf32>
    %cst_33 = arith.constant dense<0.000000e+00> : vector<2x96xf32>
    %169 = tpu.matmul %168, %4, %cst_33 {dimension_numbers = #tpu.dot_dimension_numbers<[1], [0], [0], [1], [0, 0, 1, 1], [], []>} : vector<2x64xf32>, vector<64x96xf32>, vector<2x96xf32> -> vector<2x96xf32>
    %cst_34 = arith.constant dense<0.000000e+00> : vector<2x96xf32>
    %170 = tpu.matmul %158, %5, %cst_34 {dimension_numbers = #tpu.dot_dimension_numbers<[1], [0], [0], [1], [0, 0, 1, 1], [], []>} : vector<2x32xf32>, vector<32x96xf32>, vector<2x96xf32> -> vector<2x96xf32>
    %171 = vector.extract_strided_slice %169 {offsets = [0, 0], sizes = [2, 64], strides = [1, 1]} : vector<2x96xf32> to vector<2x64xf32>
    %172 = vector.extract_strided_slice %170 {offsets = [0, 0], sizes = [2, 64], strides = [1, 1]} : vector<2x96xf32> to vector<2x64xf32>
    %173 = arith.addf %171, %172 : vector<2x64xf32>
    %174 = vector.broadcast %6 : vector<1x64xf32> to vector<2x64xf32>
    %175 = arith.addf %173, %174 : vector<2x64xf32>
    %176 = arith.negf %175 : vector<2x64xf32>
    %177 = math.exp %176 : vector<2x64xf32>
    %cst_35 = arith.constant 1.000000e+00 : f32
    %178 = vector.broadcast %cst_35 : f32 to vector<2x64xf32>
    %179 = arith.addf %178, %177 : vector<2x64xf32>
    %180 = arith.divf %178, %179 : vector<2x64xf32>
    %181 = vector.extract_strided_slice %180 {offsets = [0, 0], sizes = [2, 32], strides = [1, 1]} : vector<2x64xf32> to vector<2x32xf32>
    %182 = vector.extract_strided_slice %180 {offsets = [0, 32], sizes = [2, 32], strides = [1, 1]} : vector<2x64xf32> to vector<2x32xf32>
    %183 = vector.extract_strided_slice %169 {offsets = [0, 64], sizes = [2, 32], strides = [1, 1]} : vector<2x96xf32> to vector<2x32xf32>
    %184 = vector.broadcast %7 : vector<1x32xf32> to vector<2x32xf32>
    %185 = arith.addf %183, %184 : vector<2x32xf32>
    %186 = vector.extract_strided_slice %170 {offsets = [0, 64], sizes = [2, 32], strides = [1, 1]} : vector<2x96xf32> to vector<2x32xf32>
    %187 = vector.broadcast %8 : vector<1x32xf32> to vector<2x32xf32>
    %188 = arith.addf %186, %187 : vector<2x32xf32>
    %189 = arith.mulf %181, %188 : vector<2x32xf32>
    %190 = arith.addf %185, %189 : vector<2x32xf32>
    %191 = math.tanh %190 : vector<2x32xf32>
    %cst_36 = arith.constant 1.000000e+00 : f32
    %192 = vector.broadcast %cst_36 : f32 to vector<2x32xf32>
    %193 = arith.subf %192, %182 : vector<2x32xf32>
    %194 = arith.mulf %193, %191 : vector<2x32xf32>
    %195 = arith.mulf %182, %158 : vector<2x32xf32>
    %196 = arith.addf %194, %195 : vector<2x32xf32>
    %c4_i32 = arith.constant 4 : i32
    %197 = vector.broadcast %c4_i32 : i32 to vector<2x1xi32>
    %198 = arith.cmpi eq, %1, %197 : vector<2x1xi32>
    %199 = vector.shape_cast %198 : vector<2x1xi1> to vector<2x1xi1>
    %200 = vector.broadcast %199 : vector<2x1xi1> to vector<2x32xi1>
    %201 = arith.select %200, %196, %163 : vector<2x32xi1>, vector<2x32xf32>
    %202 = vector.extract_strided_slice %0 {offsets = [0, 5], sizes = [2, 1], strides = [1, 1]} : vector<2x8xi32> to vector<2x1xi32>
    %203 = vector.broadcast %202 : vector<2x1xi32> to vector<2x64xi32>
    %204 = arith.cmpi eq, %9, %203 : vector<2x64xi32>
    %205 = arith.extui %204 : vector<2x64xi1> to vector<2x64xi32>
    %206 = arith.sitofp %205 : vector<2x64xi32> to vector<2x64xf32>
    %cst_37 = arith.constant dense<0.000000e+00> : vector<2x96xf32>
    %207 = tpu.matmul %206, %4, %cst_37 {dimension_numbers = #tpu.dot_dimension_numbers<[1], [0], [0], [1], [0, 0, 1, 1], [], []>} : vector<2x64xf32>, vector<64x96xf32>, vector<2x96xf32> -> vector<2x96xf32>
    %cst_38 = arith.constant dense<0.000000e+00> : vector<2x96xf32>
    %208 = tpu.matmul %196, %5, %cst_38 {dimension_numbers = #tpu.dot_dimension_numbers<[1], [0], [0], [1], [0, 0, 1, 1], [], []>} : vector<2x32xf32>, vector<32x96xf32>, vector<2x96xf32> -> vector<2x96xf32>
    %209 = vector.extract_strided_slice %207 {offsets = [0, 0], sizes = [2, 64], strides = [1, 1]} : vector<2x96xf32> to vector<2x64xf32>
    %210 = vector.extract_strided_slice %208 {offsets = [0, 0], sizes = [2, 64], strides = [1, 1]} : vector<2x96xf32> to vector<2x64xf32>
    %211 = arith.addf %209, %210 : vector<2x64xf32>
    %212 = vector.broadcast %6 : vector<1x64xf32> to vector<2x64xf32>
    %213 = arith.addf %211, %212 : vector<2x64xf32>
    %214 = arith.negf %213 : vector<2x64xf32>
    %215 = math.exp %214 : vector<2x64xf32>
    %cst_39 = arith.constant 1.000000e+00 : f32
    %216 = vector.broadcast %cst_39 : f32 to vector<2x64xf32>
    %217 = arith.addf %216, %215 : vector<2x64xf32>
    %218 = arith.divf %216, %217 : vector<2x64xf32>
    %219 = vector.extract_strided_slice %218 {offsets = [0, 0], sizes = [2, 32], strides = [1, 1]} : vector<2x64xf32> to vector<2x32xf32>
    %220 = vector.extract_strided_slice %218 {offsets = [0, 32], sizes = [2, 32], strides = [1, 1]} : vector<2x64xf32> to vector<2x32xf32>
    %221 = vector.extract_strided_slice %207 {offsets = [0, 64], sizes = [2, 32], strides = [1, 1]} : vector<2x96xf32> to vector<2x32xf32>
    %222 = vector.broadcast %7 : vector<1x32xf32> to vector<2x32xf32>
    %223 = arith.addf %221, %222 : vector<2x32xf32>
    %224 = vector.extract_strided_slice %208 {offsets = [0, 64], sizes = [2, 32], strides = [1, 1]} : vector<2x96xf32> to vector<2x32xf32>
    %225 = vector.broadcast %8 : vector<1x32xf32> to vector<2x32xf32>
    %226 = arith.addf %224, %225 : vector<2x32xf32>
    %227 = arith.mulf %219, %226 : vector<2x32xf32>
    %228 = arith.addf %223, %227 : vector<2x32xf32>
    %229 = math.tanh %228 : vector<2x32xf32>
    %cst_40 = arith.constant 1.000000e+00 : f32
    %230 = vector.broadcast %cst_40 : f32 to vector<2x32xf32>
    %231 = arith.subf %230, %220 : vector<2x32xf32>
    %232 = arith.mulf %231, %229 : vector<2x32xf32>
    %233 = arith.mulf %220, %196 : vector<2x32xf32>
    %234 = arith.addf %232, %233 : vector<2x32xf32>
    %c5_i32 = arith.constant 5 : i32
    %235 = vector.broadcast %c5_i32 : i32 to vector<2x1xi32>
    %236 = arith.cmpi eq, %1, %235 : vector<2x1xi32>
    %237 = vector.shape_cast %236 : vector<2x1xi1> to vector<2x1xi1>
    %238 = vector.broadcast %237 : vector<2x1xi1> to vector<2x32xi1>
    %239 = arith.select %238, %234, %201 : vector<2x32xi1>, vector<2x32xf32>
    %240 = vector.extract_strided_slice %0 {offsets = [0, 6], sizes = [2, 1], strides = [1, 1]} : vector<2x8xi32> to vector<2x1xi32>
    %241 = vector.broadcast %240 : vector<2x1xi32> to vector<2x64xi32>
    %242 = arith.cmpi eq, %9, %241 : vector<2x64xi32>
    %243 = arith.extui %242 : vector<2x64xi1> to vector<2x64xi32>
    %244 = arith.sitofp %243 : vector<2x64xi32> to vector<2x64xf32>
    %cst_41 = arith.constant dense<0.000000e+00> : vector<2x96xf32>
    %245 = tpu.matmul %244, %4, %cst_41 {dimension_numbers = #tpu.dot_dimension_numbers<[1], [0], [0], [1], [0, 0, 1, 1], [], []>} : vector<2x64xf32>, vector<64x96xf32>, vector<2x96xf32> -> vector<2x96xf32>
    %cst_42 = arith.constant dense<0.000000e+00> : vector<2x96xf32>
    %246 = tpu.matmul %234, %5, %cst_42 {dimension_numbers = #tpu.dot_dimension_numbers<[1], [0], [0], [1], [0, 0, 1, 1], [], []>} : vector<2x32xf32>, vector<32x96xf32>, vector<2x96xf32> -> vector<2x96xf32>
    %247 = vector.extract_strided_slice %245 {offsets = [0, 0], sizes = [2, 64], strides = [1, 1]} : vector<2x96xf32> to vector<2x64xf32>
    %248 = vector.extract_strided_slice %246 {offsets = [0, 0], sizes = [2, 64], strides = [1, 1]} : vector<2x96xf32> to vector<2x64xf32>
    %249 = arith.addf %247, %248 : vector<2x64xf32>
    %250 = vector.broadcast %6 : vector<1x64xf32> to vector<2x64xf32>
    %251 = arith.addf %249, %250 : vector<2x64xf32>
    %252 = arith.negf %251 : vector<2x64xf32>
    %253 = math.exp %252 : vector<2x64xf32>
    %cst_43 = arith.constant 1.000000e+00 : f32
    %254 = vector.broadcast %cst_43 : f32 to vector<2x64xf32>
    %255 = arith.addf %254, %253 : vector<2x64xf32>
    %256 = arith.divf %254, %255 : vector<2x64xf32>
    %257 = vector.extract_strided_slice %256 {offsets = [0, 0], sizes = [2, 32], strides = [1, 1]} : vector<2x64xf32> to vector<2x32xf32>
    %258 = vector.extract_strided_slice %256 {offsets = [0, 32], sizes = [2, 32], strides = [1, 1]} : vector<2x64xf32> to vector<2x32xf32>
    %259 = vector.extract_strided_slice %245 {offsets = [0, 64], sizes = [2, 32], strides = [1, 1]} : vector<2x96xf32> to vector<2x32xf32>
    %260 = vector.broadcast %7 : vector<1x32xf32> to vector<2x32xf32>
    %261 = arith.addf %259, %260 : vector<2x32xf32>
    %262 = vector.extract_strided_slice %246 {offsets = [0, 64], sizes = [2, 32], strides = [1, 1]} : vector<2x96xf32> to vector<2x32xf32>
    %263 = vector.broadcast %8 : vector<1x32xf32> to vector<2x32xf32>
    %264 = arith.addf %262, %263 : vector<2x32xf32>
    %265 = arith.mulf %257, %264 : vector<2x32xf32>
    %266 = arith.addf %261, %265 : vector<2x32xf32>
    %267 = math.tanh %266 : vector<2x32xf32>
    %cst_44 = arith.constant 1.000000e+00 : f32
    %268 = vector.broadcast %cst_44 : f32 to vector<2x32xf32>
    %269 = arith.subf %268, %258 : vector<2x32xf32>
    %270 = arith.mulf %269, %267 : vector<2x32xf32>
    %271 = arith.mulf %258, %234 : vector<2x32xf32>
    %272 = arith.addf %270, %271 : vector<2x32xf32>
    %c6_i32 = arith.constant 6 : i32
    %273 = vector.broadcast %c6_i32 : i32 to vector<2x1xi32>
    %274 = arith.cmpi eq, %1, %273 : vector<2x1xi32>
    %275 = vector.shape_cast %274 : vector<2x1xi1> to vector<2x1xi1>
    %276 = vector.broadcast %275 : vector<2x1xi1> to vector<2x32xi1>
    %277 = arith.select %276, %272, %239 : vector<2x32xi1>, vector<2x32xf32>
    %278 = vector.extract_strided_slice %0 {offsets = [0, 7], sizes = [2, 1], strides = [1, 1]} : vector<2x8xi32> to vector<2x1xi32>
    %279 = vector.broadcast %278 : vector<2x1xi32> to vector<2x64xi32>
    %280 = arith.cmpi eq, %9, %279 : vector<2x64xi32>
    %281 = arith.extui %280 : vector<2x64xi1> to vector<2x64xi32>
    %282 = arith.sitofp %281 : vector<2x64xi32> to vector<2x64xf32>
    %cst_45 = arith.constant dense<0.000000e+00> : vector<2x96xf32>
    %283 = tpu.matmul %282, %4, %cst_45 {dimension_numbers = #tpu.dot_dimension_numbers<[1], [0], [0], [1], [0, 0, 1, 1], [], []>} : vector<2x64xf32>, vector<64x96xf32>, vector<2x96xf32> -> vector<2x96xf32>
    %cst_46 = arith.constant dense<0.000000e+00> : vector<2x96xf32>
    %284 = tpu.matmul %272, %5, %cst_46 {dimension_numbers = #tpu.dot_dimension_numbers<[1], [0], [0], [1], [0, 0, 1, 1], [], []>} : vector<2x32xf32>, vector<32x96xf32>, vector<2x96xf32> -> vector<2x96xf32>
    %285 = vector.extract_strided_slice %283 {offsets = [0, 0], sizes = [2, 64], strides = [1, 1]} : vector<2x96xf32> to vector<2x64xf32>
    %286 = vector.extract_strided_slice %284 {offsets = [0, 0], sizes = [2, 64], strides = [1, 1]} : vector<2x96xf32> to vector<2x64xf32>
    %287 = arith.addf %285, %286 : vector<2x64xf32>
    %288 = vector.broadcast %6 : vector<1x64xf32> to vector<2x64xf32>
    %289 = arith.addf %287, %288 : vector<2x64xf32>
    %290 = arith.negf %289 : vector<2x64xf32>
    %291 = math.exp %290 : vector<2x64xf32>
    %cst_47 = arith.constant 1.000000e+00 : f32
    %292 = vector.broadcast %cst_47 : f32 to vector<2x64xf32>
    %293 = arith.addf %292, %291 : vector<2x64xf32>
    %294 = arith.divf %292, %293 : vector<2x64xf32>
    %295 = vector.extract_strided_slice %294 {offsets = [0, 0], sizes = [2, 32], strides = [1, 1]} : vector<2x64xf32> to vector<2x32xf32>
    %296 = vector.extract_strided_slice %294 {offsets = [0, 32], sizes = [2, 32], strides = [1, 1]} : vector<2x64xf32> to vector<2x32xf32>
    %297 = vector.extract_strided_slice %283 {offsets = [0, 64], sizes = [2, 32], strides = [1, 1]} : vector<2x96xf32> to vector<2x32xf32>
    %298 = vector.broadcast %7 : vector<1x32xf32> to vector<2x32xf32>
    %299 = arith.addf %297, %298 : vector<2x32xf32>
    %300 = vector.extract_strided_slice %284 {offsets = [0, 64], sizes = [2, 32], strides = [1, 1]} : vector<2x96xf32> to vector<2x32xf32>
    %301 = vector.broadcast %8 : vector<1x32xf32> to vector<2x32xf32>
    %302 = arith.addf %300, %301 : vector<2x32xf32>
    %303 = arith.mulf %295, %302 : vector<2x32xf32>
    %304 = arith.addf %299, %303 : vector<2x32xf32>
    %305 = math.tanh %304 : vector<2x32xf32>
    %cst_48 = arith.constant 1.000000e+00 : f32
    %306 = vector.broadcast %cst_48 : f32 to vector<2x32xf32>
    %307 = arith.subf %306, %296 : vector<2x32xf32>
    %308 = arith.mulf %307, %305 : vector<2x32xf32>
    %309 = arith.mulf %296, %272 : vector<2x32xf32>
    %310 = arith.addf %308, %309 : vector<2x32xf32>
    %c7_i32 = arith.constant 7 : i32
    %311 = vector.broadcast %c7_i32 : i32 to vector<2x1xi32>
    %312 = arith.cmpi eq, %1, %311 : vector<2x1xi32>
    %313 = vector.shape_cast %312 : vector<2x1xi1> to vector<2x1xi1>
    %314 = vector.broadcast %313 : vector<2x1xi1> to vector<2x32xi1>
    %315 = arith.select %314, %310, %277 : vector<2x32xi1>, vector<2x32xf32>
    %c0_49 = arith.constant 0 : index
    %c0_50 = arith.constant 0 : index
    %316 = vector.load %arg9[%c0_49, %c0_50] : memref<32x128xf32, #tpu.memory_space<vmem>>, vector<32x128xf32>
    %cst_51 = arith.constant dense<0.000000e+00> : vector<2x128xf32>
    %317 = tpu.matmul %315, %316, %cst_51 {dimension_numbers = #tpu.dot_dimension_numbers<[1], [0], [0], [1], [0, 0, 1, 1], [], []>} : vector<2x32xf32>, vector<32x128xf32>, vector<2x128xf32> -> vector<2x128xf32>
    %c0_52 = arith.constant 0 : index
    %c0_53 = arith.constant 0 : index
    %318 = vector.load %arg10[%c0_52, %c0_53] : memref<1x128xf32, #tpu.memory_space<vmem>>, vector<1x128xf32>
    %319 = vector.broadcast %318 : vector<1x128xf32> to vector<2x128xf32>
    %320 = arith.addf %317, %319 : vector<2x128xf32>
    %c0_54 = arith.constant 0 : index
    %c0_55 = arith.constant 0 : index
    %321 = vector.load %arg11[%c0_54, %c0_55] : memref<2x128xf32, #tpu.memory_space<vmem>>, vector<2x128xf32>
    tpu.vector_store %arg11[%c0_54, %c0_55], %320 {strides = array<i32>} : memref<2x128xf32, #tpu.memory_space<vmem>>, vector<2x128xf32>,
    %cst_56 = arith.constant dense<0xFF800000> : vector<2xf32>
    %322 = vector.multi_reduction <maximumf>, %320, %cst_56 [1] : vector<2x128xf32> to vector<2xf32>
    %323 = vector.shape_cast %322 : vector<2xf32> to vector<2x1xf32>
    %324 = vector.broadcast %323 : vector<2x1xf32> to vector<2x128xf32>
    %325 = arith.subf %320, %324 : vector<2x128xf32>
    %326 = math.exp %325 : vector<2x128xf32>
    %cst_57 = arith.constant dense<0.000000e+00> : vector<2xf32>
    %327 = vector.multi_reduction <add>, %326, %cst_57 [1] : vector<2x128xf32> to vector<2xf32>
    %328 = vector.shape_cast %327 : vector<2xf32> to vector<2x1xf32>
    %329 = vector.broadcast %328 : vector<2x1xf32> to vector<2x128xf32>
    %330 = arith.divf %326, %329 : vector<2x128xf32>
    %cst_58 = arith.constant dense<0xFF800000> : vector<2xf32>
    %331 = vector.multi_reduction <maximumf>, %330, %cst_58 [1] : vector<2x128xf32> to vector<2xf32>
    %332 = vector.shape_cast %331 : vector<2xf32> to vector<2x1xf32>
    %c0_59 = arith.constant 0 : index
    %c0_60 = arith.constant 0 : index
    %333 = vector.load %arg12[%c0_59, %c0_60] : memref<2x1xf32, #tpu.memory_space<vmem>>, vector<2x1xf32>
    tpu.vector_store %arg12[%c0_59, %c0_60], %332 {strides = array<i32>} : memref<2x1xf32, #tpu.memory_space<vmem>>, vector<2x1xf32>,
    %334 = tpu.iota {dimensions = array<i32: 1>} : vector<2x128xi32>
    %cst_61 = arith.constant dense<0xFF800000> : vector<2xf32>
    %335 = vector.multi_reduction <maximumf>, %320, %cst_61 [1] : vector<2x128xf32> to vector<2xf32>
    %336 = vector.shape_cast %335 : vector<2xf32> to vector<2x1xf32>
    %337 = vector.broadcast %336 : vector<2x1xf32> to vector<2x128xf32>
    %338 = arith.cmpf oge, %320, %337 : vector<2x128xf32>
    %c128_i32 = arith.constant 128 : i32
    %339 = vector.broadcast %c128_i32 : i32 to vector<2x128xi32>
    %340 = arith.select %338, %334, %339 : vector<2x128xi1>, vector<2x128xi32>
    %cst_62 = arith.constant dense<2147483647> : vector<2xi32>
    %341 = vector.multi_reduction <minsi>, %340, %cst_62 [1] : vector<2x128xi32> to vector<2xi32>
    %342 = vector.shape_cast %341 : vector<2xi32> to vector<2x1xi32>
    %343 = tpu.iota {dimensions = array<i32: 1>} : vector<2x8xi32>
    %344 = vector.extract_strided_slice %0 {offsets = [0, 0], sizes = [2, 1], strides = [1, 1]} : vector<2x8xi32> to vector<2x1xi32>
    %345 = vector.extract_strided_slice %0 {offsets = [0, 0], sizes = [2, 7], strides = [1, 1]} : vector<2x8xi32> to vector<2x7xi32>
    %346 = tpu.concatenate %344, %345 in 1 : vector<2x1xi32>, vector<2x7xi32> -> vector<2x8xi32>
    %347 = vector.broadcast %1 : vector<2x1xi32> to vector<2x8xi32>
    %348 = arith.cmpi slt, %343, %347 : vector<2x8xi32>
    %349 = vector.broadcast %1 : vector<2x1xi32> to vector<2x8xi32>
    %350 = arith.cmpi eq, %343, %349 : vector<2x8xi32>
    %351 = vector.shape_cast %342 : vector<2x1xi32> to vector<2x1xi32>
    %352 = vector.broadcast %351 : vector<2x1xi32> to vector<2x8xi32>
    %353 = arith.select %350, %352, %346 : vector<2x8xi1>, vector<2x8xi32>
    %354 = arith.select %348, %0, %353 : vector<2x8xi1>, vector<2x8xi32>
    %c0_63 = arith.constant 0 : index
    %c0_64 = arith.constant 0 : index
    %355 = vector.load %arg13[%c0_63, %c0_64] : memref<2x8xi32, #tpu.memory_space<vmem>>, vector<2x8xi32>
    tpu.vector_store %arg13[%c0_63, %c0_64], %354 {strides = array<i32>} : memref<2x8xi32, #tpu.memory_space<vmem>>, vector<2x8xi32>,
    %c0_65 = arith.constant 0 : index
    %c0_66 = arith.constant 0 : index
    %356 = vector.load %arg2[%c0_65, %c0_66] : memref<2x1xi32, #tpu.memory_space<vmem>>, vector<2x1xi32>
    %c8_i32 = arith.constant 8 : i32
    %357 = vector.broadcast %c8_i32 : i32 to vector<2x1xi32>
    %358 = arith.cmpi slt, %356, %357 : vector<2x1xi32>
    %c1_i32_67 = arith.constant 1 : i32
    %359 = vector.broadcast %c1_i32_67 : i32 to vector<2x1xi32>
    %360 = arith.addi %356, %359 : vector<2x1xi32>
    %361 = arith.select %358, %360, %356 : vector<2x1xi1>, vector<2x1xi32>
    %c0_68 = arith.constant 0 : index
    %c0_69 = arith.constant 0 : index
    %362 = vector.load %arg14[%c0_68, %c0_69] : memref<2x1xi32, #tpu.memory_space<vmem>>, vector<2x1xi32>
    tpu.vector_store %arg14[%c0_68, %c0_69], %361 {strides = array<i32>} : memref<2x1xi32, #tpu.memory_space<vmem>>, vector<2x1xi32>,
    return
  }
}

</mosaic_0001>

<bundles_post_ra>
// kernel: tpu_custom_call.1
= control target key start
LH: loop header
LB: loop body
LE: loop exit
PB: predicated region body
PF: predicated region fallthrough
CT: control target
= control target key end

     0   :  { %20 = vsyncpa [#allocation3], 0  ;;  %vm56_vm0 = vcmask 130048   ;;  %v2472_v4 = vmov 0   ;;  %v2473_v7 = vmov 0.0   ;;  %vm2474_vm1 = vmmov 0   ;;  %s3089_s0 = inlined_call_operand.vmem [shape: s32[2,8], index: 0, kind: input, shape index: {}]   ;;  %s3090_s1 = inlined_call_operand.vmem [shape: s32[2,1], index: 1, kind: input, shape index: {}]   ;;  %s3091_s2 = inlined_call_operand.vmem [shape: s32[2,1], index: 2, kind: input, shape index: {}]   ;;  %s3092_s3 = inlined_call_operand.vmem [shape: f32[64,16], index: 3, kind: input, shape index: {}]   ;;  %s3093_s4 = inlined_call_operand.vmem [shape: f32[16,96], index: 4, kind: input, shape index: {}]   ;;  %s3094_s5 = inlined_call_operand.vmem [shape: f32[32,96], index: 5, kind: input, shape index: {}]   ;;  %s3095_s6 = inlined_call_operand.vmem [shape: f32[1,64], index: 6, kind: input, shape index: {}]   ;;  %s3096_s7 = inlined_call_operand.vmem [shape: f32[1,32], index: 7, kind: input, shape index: {}]   ;;  %s3097_s8 = inlined_call_operand.vmem [shape: f32[1,32], index: 8, kind: input, shape index: {}]   ;;  %s3098_s9 = inlined_call_operand.vmem [shape: f32[32,128], index: 9, kind: input, shape index: {}]   ;;  %s3099_s10 = inlined_call_operand.vmem [shape: f32[1,128], index: 10, kind: input, shape index: {}]   ;;  %s3100_s11 = inlined_call_operand.hbm [shape: f32[2,128], index: 11, kind: output, shape index: {0}]   ;;  %s3101_s12 = inlined_call_operand.vmem [shape: f32[2,1], index: 12, kind: output, shape index: {1}]   ;;  %s3102_s13 = inlined_call_operand.hbm [shape: s32[2,8], index: 13, kind: output, shape index: {2}]   ;;  %s3103_s14 = inlined_call_operand.vmem [shape: s32[2,1], index: 14, kind: output, shape index: {3}]  }
   0x1   :  { %v55_v0 = vld [vmem:[%s3093_s4 + $0x8] sm:$0xff]  ;;  %v54_v1 = vld [vmem:[%s3093_s4] sm:$0xff]  ;;  %2365 = vset.pattern.permute.xlu0 %v2472_v4  ;;  %v48_v5 = vld [vmem:[%s3092_s3 + $0x10] sm:$0xff]  ;;  %2099 = vmatprep.subr.mxu1 %v2473_v7 }
   0x2   :  { %v46_v2 = vld [vmem:[%s3092_s3] sm:$0xff]  ;;  %2083 = vmatprep.subr.mxu0 %v55_v0  ;;  %v47_v3 = vld [vmem:[%s3092_s3 + $0x8] sm:$0xff]  ;;  %v2582_v6 = vld [vmem:[%s3094_s5 + $0x18] sm:$0xff]  ;;  %2115 = vmatprep.mubr.msk.f32.mxu1 %vm2474_vm1, %v2473_v7 }
   0x3   :  { %2087 = vmatprep.mubr.msk.f32.mxu0 %vm56_vm0, %v46_v2  ;;  %2084 = vmatpush3.msra.mxu0 %v55_v0  ;;  %v2588_v8 = vld [vmem:[%s3089_s0] sm:$0x3]  ;;  %v2597_v9 = vld [vmem:[%s3094_s5 + $0x10] sm:$0xff] }
   0x4   :  { %2085 = vmatprep.subr.mxu0 %v54_v1 }
   0x5   :  { %2086 = vmatpush3.msra.mxu0 %v54_v1 }
   0x6   :  { %2088 = vmatmul.mubr.msk.f32.vlgmr.msra.gmra.mxu0 %vm56_vm0, %v47_v3  ;;  %2118 = vmatprep.subr.mxu0 %v2473_v7 }
   0x7   :  { %21 = vsyncpa [#allocation5], 0  ;;  %2090 = vmatprep.mubr.msk.f32.mxu0 %vm56_vm0, %v48_v5  ;;  %v49_v10 = vld [vmem:[%s3092_s3 + $0x18] sm:$0xff]  ;;  %2119 = vmatpush3.msra.mxu0 %v2582_v6  ;;  %v50_v11 = vld [vmem:[%s3092_s3 + $0x20] sm:$0xff]  ;;  %v193_v27 = vlaneseq  ;;  %vm201_vm3 = vcmask 523264   ;;  %v2476_v46 = vmov 1  }
   0x8   :  { %2120 = vmatprep.subr.mxu0 %v2473_v7  ;;  %196 = vperm.xlu0 %2365, %v2588_v8   ;;  %v2612_v12 = vld [vmem:[%s3094_s5 + $0x8] sm:$0xff]  ;;  %v1925_v13 = vld [vmem:[%s3097_s8] ss:$0 sm:$0xff]  ;;  %v52_v16 = vld [vmem:[%s3092_s3 + $0x30] sm:$0xff]  ;;  %s2475_s8 = smov 64   ;;  %vm275_vm5 = vcmask 261120  }
   0x9   :  { %2121 = vmatpush3.msra.mxu0 %v2597_v9  ;;  %v2623_v14 = vld [vmem:[%s3094_s5] sm:$0xff]  ;;  %v51_v15 = vld [vmem:[%s3092_s3 + $0x28] sm:$0xff]  ;;  %v53_v17 = vld [vmem:[%s3092_s3 + $0x38] sm:$0xff]  ;;  %v2681_v31 = vand.u32 127, %v193_v27  ;;  %2366 = vset.pattern.permute.xlu1 %v2476_v46  ;;  %s2484_s24 = smov [#allocation2]  }
   0xa   :  { %2091 = vmatmul.mubr.msk.f32.gmra.mxu0 %vm56_vm0, %v49_v10  ;;  %2122 = vmatprep.subr.mxu0 %v2473_v7  ;;  %v1924_v33 = vld [vmem:[%s3096_s7] ss:$0 sm:$0xff] }
   0xb   :  { %2093 = vmatprep.mubr.msk.f32.mxu0 %vm56_vm0, %v50_v11  ;;  %2123 = vmatpush3.msra.mxu0 %v2612_v12  ;;  %v2722_v35 = vld [vmem:[%s3095_s6] ss:$0 sm:$0xff]  ;;  %s2477_s6 = smov 96  }
   0xc   :  { %2124 = vmatprep.subr.mxu0 %v2473_v7  ;;  %377 = vrot.lane.b32.xlu0 %v1925_v13, %s2475_s8 }
   0xd   :  { %2125 = vmatpush3.msra.mxu0 %v2623_v14 }
   0xe   :  { %2094 = vmatmul.mubr.msk.f32.gmra.mxu0 %vm56_vm0, %v51_v15  ;;  %2148 = vmatprep.subr.mxu0 %v2473_v7 }
   0xf   :  { %2096 = vmatprep.mubr.msk.f32.mxu0 %vm56_vm0, %v52_v16  ;;  %v2478_v16 = vmov 2  }
  0x10   :  { %2367 = vset.pattern.permute.xlu0 %v2478_v16 }
  0x12   :  { %2097 = vmatmul.mubr.msk.f32.gmra.mxu0 %vm56_vm0, %v53_v17 }
  0x13   :  { %2126 = vmatprep.mubr.msk.f32.mxu0 %vm2474_vm1, %v2473_v7 }
  0x16   :  { %2127 = vmatmul.mubr.f32.vlgmr.msra.gmra.mxu0 %v2473_v7 }
  0x17   :  { %2149 = vmatpush3.msra.mxu0 %v2582_v6  ;;  %2156 = vmatprep.mubr.msk.f32.mxu0 %vm2474_vm1, %v2473_v7 }
  0x18   :  { %2150 = vmatprep.subr.mxu0 %v2473_v7 }
  0x19   :  { %2151 = vmatpush3.msra.mxu0 %v2597_v9 }
  0x1a   :  { %2152 = vmatprep.subr.mxu0 %v2473_v7 }
  0x1b   :  { %2153 = vmatpush3.msra.mxu0 %v2612_v12 }
  0x1c   :  { %2154 = vmatprep.subr.mxu0 %v2473_v7 }
  0x1d   :  { %2155 = vmatpush3.msra.mxu0 %v2623_v14 }
  0x1e   :  { %2159 = vmatprep.subr.mxu0 %v2473_v7 }
  0x83   :  { %v197_v24 = vpop.permute.xlu0 %196 }
  0x84   :  { %vm198_vm2 = vcmp.eq.s32.totalorder %v2681_v31, %v197_v24 }
  0x85   :  { %v1920_v34 = vsel %vm198_vm2, 1.0, %v2473_v7 }
  0x87   :  { %v2674_v28 = vpop.permute.xlu0 %377 }
  0xc6   :  { %v2656_v18 = vpop.f32.mrf.mxu0 }
  0xc8   :  { %v2658_v19 = vpop.f32.mrf.mxu0 }
  0xca   :  { %v2660_v20 = vpop.f32.mrf.mxu0 }
  0xcc   :  { %v2662_v21 = vpop.f32.mrf.mxu0 }
  0xce   :  { %v2664_v22 = vpop.f32.mrf.mxu0 }
  0xd0   :  { %v2666_v23 = vpop.f32.mrf.mxu0 }
  0xd2   :  { %v2668_v25 = vpop.f32.mrf.mxu0 }
  0xd3   :  { %2100 = vmatpush3.msra.mxu1 %v2668_v25 }
  0xd4   :  { %v2671_v26 = vpop.f32.mrf.mxu0  ;;  %2101 = vmatprep.subr.mxu1 %v2473_v7 }
  0xd5   :  { %2102 = vmatpush3.msra.mxu1 %v2671_v26 }
  0xd6   :  { %2103 = vmatprep.subr.mxu1 %v2473_v7  ;;  %v345_v29 = vpop.f32.mrf.mxu0 }
  0xd7   :  { %2104 = vmatpush3.msra.mxu1 %v2664_v22  ;;  %v380_v30 = vadd.f32 %v2674_v28, %v345_v29 }
  0xd8   :  { %2105 = vmatprep.subr.mxu1 %v2473_v7  ;;  %v2128_v32 = vpop.f32.mrf.mxu0 }
  0xd9   :  { %2106 = vmatpush3.msra.mxu1 %v2666_v23  ;;  %382 = vrot.lane.b32.xlu1 %v380_v30, %s2475_s8 }
  0xda   :  { %2107 = vmatprep.subr.mxu1 %v2473_v7 }
  0xdb   :  { %2108 = vmatpush3.msra.mxu1 %v2660_v20 }
  0xdc   :  { %2109 = vmatprep.subr.mxu1 %v2473_v7 }
  0xdd   :  { %2110 = vmatpush3.msra.mxu1 %v2662_v21  ;;  %368 = vrot.lane.b32.xlu1 %v1924_v33, %s2475_s8 }
  0xde   :  { %2111 = vmatprep.subr.mxu1 %v2473_v7 }
  0xdf   :  { %2112 = vmatpush3.msra.mxu1 %v2656_v18 }
  0xe0   :  { %2113 = vmatprep.subr.mxu1 %v2473_v7 }
  0xe1   :  { %2114 = vmatpush3.msra.mxu1 %v2658_v19 }
  0xe2   :  { %2116 = vmatmul.mubr.msk.f32.vlgmr.msra.gmra.mxu1 %vm201_vm3, %v1920_v34  ;;  %2129 = vmatprep.subr.mxu1 %v2473_v7 }
  0xe3   :  { %2130 = vmatpush3.msra.mxu1 %v2668_v25  ;;  %2145 = vmatprep.mubr.msk.f32.mxu1 %vm2474_vm1, %v2473_v7 }
  0xe4   :  { %2131 = vmatprep.subr.mxu1 %v2473_v7 }
  0xe5   :  { %2132 = vmatpush3.msra.mxu1 %v2671_v26 }
  0xe6   :  { %2133 = vmatprep.subr.mxu1 %v2473_v7 }
  0xe7   :  { %2134 = vmatpush3.msra.mxu1 %v2664_v22 }
  0xe8   :  { %2135 = vmatprep.subr.mxu1 %v2473_v7 }
  0xe9   :  { %2136 = vmatpush3.msra.mxu1 %v2666_v23 }
  0xea   :  { %2137 = vmatprep.subr.mxu1 %v2473_v7 }
  0xeb   :  { %2138 = vmatpush3.msra.mxu1 %v2660_v20 }
  0xec   :  { %2139 = vmatprep.subr.mxu1 %v2473_v7 }
  0xed   :  { %2140 = vmatpush3.msra.mxu1 %v2662_v21 }
  0xee   :  { %2141 = vmatprep.subr.mxu1 %v2473_v7 }
  0xef   :  { %2142 = vmatpush3.msra.mxu1 %v2656_v18 }
  0xf0   :  { %2143 = vmatprep.subr.mxu1 %v2473_v7 }
  0xf1   :  { %2144 = vmatpush3.msra.mxu1 %v2658_v19 }
  0xf2   :  { %2178 = vmatprep.subr.mxu1 %v2473_v7 }
 0x14b   :  { %v383_v44 = vpop.permute.xlu1 %382 }
 0x14f   :  { %v2726_v47 = vpop.permute.xlu1 %368 }
 0x1a2   :  { %v271_v36 = vpop.f32.mrf.mxu1 }
 0x1a3   :  { %v349_v37 = vadd.f32 %v345_v29, %v271_v36  ;;  %v371_v48 = vadd.f32 %v2726_v47, %v271_v36 }
 0x1a4   :  { %v2117_v38 = vpop.f32.mrf.mxu1 }
 0x1a5   :  { %v356_v39 = vadd.f32 %v2722_v35, %v349_v37 }
 0x1a7   :  { %v1923_v40 = vmul.f32 -1.442695, %v356_v39 }
 0x1a9   :  { %2375 = vpow2.f32 %v1923_v40 }
 0x1b6   :  { %v2376_v41 = vpop.eup %2375 }
 0x1b7   :  { %v360_v42 = vadd.f32 1.0, %v2376_v41 }
 0x1b9   :  { %2377 = vrcp.f32 %v360_v42 }
 0x1c6   :  { %v2378_v43 = vpop.eup %2377 }
 0x1c7   :  { %v385_v45 = vmul.f32 %v2378_v43, %v383_v44  ;;  %v392_v52 = vsub.f32 1.0, %v2378_v43  ;;  %v398_v54 = vmul.f32 0.0, %v2378_v43 }
 0x1c9   :  { %387 = vrot.lane.b32.xlu0 %v385_v45, %s2475_s8 }
 0x23b   :  { %v388_v49 = vpop.permute.xlu0 %387 }
 0x23c   :  { %v390_v50 = vadd.f32 %v388_v49, %v371_v48 }
 0x23e   :  { %2379 = vtanh.f32 %v390_v50 }
 0x24b   :  { %v2380_v51 = vpop.eup %2379 }
 0x24c   :  { %394 = vrot.lane.b32.xlu1 %v2380_v51, %s2477_s6 }
 0x250   :  { %408 = vperm.xlu1 %2366, %v2588_v8  }
 0x254   :  { %2374 = vset.pattern.permute.xlu1 %v2472_v4 }
 0x2be   :  { %v395_v53 = vpop.permute.xlu1 %394 }
 0x2bf   :  { %v397_v55 = vmul.f32 %v395_v53, %v392_v52 }
 0x2c1   :  { %v2732_v56 = vadd.f32 %v398_v54, %v397_v55  ;;  %v2479_v54 = vmov 3  }
 0x2c3   :  { %487 = vrot.lane.b32.xlu0 %v2732_v56, %s2477_s6 }
 0x2cb   :  { %v409_v57 = vpop.permute.xlu1 %408 }
 0x2cc   :  { %vm410_vm4 = vcmp.eq.s32.totalorder %v2681_v31, %v409_v57 }
 0x2cd   :  { %v1926_v58 = vsel %vm410_vm4, 1.0, %v2473_v7 }
 0x2ce   :  { %2146 = vmatmul.mubr.msk.f32.vlgmr.msra.gmra.mxu1 %vm201_vm3, %v1926_v58 }
 0x2cf   :  { %2179 = vmatpush3.msra.mxu1 %v2582_v6  ;;  %2186 = vmatprep.mubr.msk.f32.mxu1 %vm2474_vm1, %v2473_v7 }
 0x2d0   :  { %2180 = vmatprep.subr.mxu1 %v2473_v7 }
 0x2d1   :  { %2181 = vmatpush3.msra.mxu1 %v2597_v9 }
 0x2d2   :  { %2182 = vmatprep.subr.mxu1 %v2473_v7 }
 0x2d3   :  { %2183 = vmatpush3.msra.mxu1 %v2612_v12 }
 0x2d4   :  { %2184 = vmatprep.subr.mxu1 %v2473_v7 }
 0x2d5   :  { %2185 = vmatpush3.msra.mxu1 %v2623_v14 }
 0x2d6   :  { %2189 = vmatprep.subr.mxu1 %v2473_v7 }
 0x335   :  { %v488_v59 = vpop.permute.xlu0 %487 }
 0x336   :  { %2157 = vmatmul.mubr.msk.f32.vlgmr.msra.gmra.mxu0 %vm275_vm5, %v488_v59 }
 0x337   :  { %2160 = vmatpush3.msra.mxu0 %v2668_v25  ;;  %2175 = vmatprep.mubr.msk.f32.mxu0 %vm2474_vm1, %v2473_v7 }
 0x338   :  { %2161 = vmatprep.subr.mxu0 %v2473_v7 }
 0x339   :  { %2162 = vmatpush3.msra.mxu0 %v2671_v26 }
 0x33a   :  { %2163 = vmatprep.subr.mxu0 %v2473_v7 }
 0x33b   :  { %2164 = vmatpush3.msra.mxu0 %v2664_v22 }
 0x33c   :  { %2165 = vmatprep.subr.mxu0 %v2473_v7 }
 0x33d   :  { %2166 = vmatpush3.msra.mxu0 %v2666_v23 }
 0x33e   :  { %2167 = vmatprep.subr.mxu0 %v2473_v7 }
 0x33f   :  { %2168 = vmatpush3.msra.mxu0 %v2660_v20 }
 0x340   :  { %2169 = vmatprep.subr.mxu0 %v2473_v7 }
 0x341   :  { %2170 = vmatpush3.msra.mxu0 %v2662_v21 }
 0x342   :  { %2171 = vmatprep.subr.mxu0 %v2473_v7 }
 0x343   :  { %2172 = vmatpush3.msra.mxu0 %v2656_v18 }
 0x344   :  { %2173 = vmatprep.subr.mxu0 %v2473_v7 }
 0x345   :  { %2174 = vmatpush3.msra.mxu0 %v2658_v19 }
 0x346   :  { %2208 = vmatprep.subr.mxu0 %v2473_v7 }
 0x38e   :  { %v482_v60 = vpop.f32.mrf.mxu1 }
 0x38f   :  { %v569_v17 = vadd.f32 %v482_v60, %v2726_v47 }
 0x390   :  { %v2147_v61 = vpop.f32.mrf.mxu1 }
 0x3f6   :  { %v557_v62 = vpop.f32.mrf.mxu0 }
 0x3f7   :  { %v570_v63 = vadd.f32 %v557_v62, %v2674_v28  ;;  %v561_v1 = vadd.f32 %v557_v62, %v482_v60 }
 0x3f8   :  { %v2158_v0 = vpop.f32.mrf.mxu0 }
 0x3f9   :  { %572 = vrot.lane.b32.xlu0 %v570_v63, %s2475_s8  ;;  %v562_v2 = vadd.f32 %v2722_v35, %v561_v1 }
 0x3fb   :  { %v1929_v3 = vmul.f32 -1.442695, %v562_v2 }
 0x3fd   :  { %2381 = vpow2.f32 %v1929_v3 }
 0x40a   :  { %v2382_v5 = vpop.eup %2381 }
 0x40b   :  { %v566_v10 = vadd.f32 1.0, %v2382_v5 }
 0x40d   :  { %2383 = vrcp.f32 %v566_v10 }
 0x41a   :  { %v2384_v11 = vpop.eup %2383 }
 0x41b   :  { %v582_v30 = vsub.f32 1.0, %v2384_v11  ;;  %v588_v33 = vmul.f32 %v2384_v11, %v2732_v56 }
 0x46b   :  { %v573_v13 = vpop.permute.xlu0 %572 }
 0x46c   :  { %v575_v15 = vmul.f32 %v2384_v11, %v573_v13 }
 0x46e   :  { %577 = vrot.lane.b32.xlu1 %v575_v15, %s2475_s8 }
 0x4e0   :  { %v578_v24 = vpop.permute.xlu1 %577 }
 0x4e1   :  { %v580_v27 = vadd.f32 %v578_v24, %v569_v17 }
 0x4e3   :  { %2385 = vtanh.f32 %v580_v27 }
 0x4f0   :  { %v2386_v29 = vpop.eup %2385 }
 0x4f1   :  { %584 = vrot.lane.b32.xlu0 %v2386_v29, %s2477_s6 }
 0x4f5   :  { %598 = vperm.xlu0 %2367, %v2588_v8  }
 0x4f9   :  { %2368 = vset.pattern.permute.xlu0 %v2479_v54 }
 0x563   :  { %v585_v32 = vpop.permute.xlu0 %584 }
 0x564   :  { %v587_v34 = vmul.f32 %v585_v32, %v582_v30 }
 0x566   :  { %v2776_v36 = vadd.f32 %v588_v33, %v587_v34  ;;  %v2480_v34 = vmov 4  }
 0x568   :  { %677 = vrot.lane.b32.xlu1 %v2776_v36, %s2477_s6 }
 0x570   :  { %v599_v37 = vpop.permute.xlu0 %598 }
 0x571   :  { %vm600_vm6 = vcmp.eq.s32.totalorder %v2681_v31, %v599_v37 }
 0x572   :  { %v1930_v38 = vsel %vm600_vm6, 1.0, %v2473_v7 }
 0x573   :  { %2176 = vmatmul.mubr.msk.f32.vlgmr.msra.gmra.mxu0 %vm201_vm3, %v1930_v38 }
 0x574   :  { %2209 = vmatpush3.msra.mxu0 %v2582_v6  ;;  %2216 = vmatprep.mubr.msk.f32.mxu0 %vm2474_vm1, %v2473_v7 }
 0x575   :  { %2210 = vmatprep.subr.mxu0 %v2473_v7 }
 0x576   :  { %2211 = vmatpush3.msra.mxu0 %v2597_v9 }
 0x577   :  { %2212 = vmatprep.subr.mxu0 %v2473_v7 }
 0x578   :  { %2213 = vmatpush3.msra.mxu0 %v2612_v12 }
 0x579   :  { %2214 = vmatprep.subr.mxu0 %v2473_v7 }
 0x57a   :  { %2215 = vmatpush3.msra.mxu0 %v2623_v14 }
 0x57b   :  { %2219 = vmatprep.subr.mxu0 %v2473_v7 }
 0x5da   :  { %v678_v39 = vpop.permute.xlu1 %677 }
 0x5db   :  { %2187 = vmatmul.mubr.msk.f32.vlgmr.msra.gmra.mxu1 %vm275_vm5, %v678_v39 }
 0x5dc   :  { %2190 = vmatpush3.msra.mxu1 %v2668_v25  ;;  %2205 = vmatprep.mubr.msk.f32.mxu1 %vm2474_vm1, %v2473_v7 }
 0x5dd   :  { %2191 = vmatprep.subr.mxu1 %v2473_v7 }
 0x5de   :  { %2192 = vmatpush3.msra.mxu1 %v2671_v26 }
 0x5df   :  { %2193 = vmatprep.subr.mxu1 %v2473_v7 }
 0x5e0   :  { %2194 = vmatpush3.msra.mxu1 %v2664_v22 }
 0x5e1   :  { %2195 = vmatprep.subr.mxu1 %v2473_v7 }
 0x5e2   :  { %2196 = vmatpush3.msra.mxu1 %v2666_v23 }
 0x5e3   :  { %2197 = vmatprep.subr.mxu1 %v2473_v7 }
 0x5e4   :  { %2198 = vmatpush3.msra.mxu1 %v2660_v20 }
 0x5e5   :  { %2199 = vmatprep.subr.mxu1 %v2473_v7 }
 0x5e6   :  { %2200 = vmatpush3.msra.mxu1 %v2662_v21 }
 0x5e7   :  { %2201 = vmatprep.subr.mxu1 %v2473_v7 }
 0x5e8   :  { %2202 = vmatpush3.msra.mxu1 %v2656_v18 }
 0x5e9   :  { %2203 = vmatprep.subr.mxu1 %v2473_v7 }
 0x5ea   :  { %2204 = vmatpush3.msra.mxu1 %v2658_v19 }
 0x5eb   :  { %2238 = vmatprep.subr.mxu1 %v2473_v7 }
 0x633   :  { %v672_v40 = vpop.f32.mrf.mxu0 }
 0x634   :  { %v759_v55 = vadd.f32 %v672_v40, %v2726_v47 }
 0x635   :  { %v2177_v41 = vpop.f32.mrf.mxu0 }
 0x69b   :  { %v747_v42 = vpop.f32.mrf.mxu1 }
 0x69c   :  { %v760_v43 = vadd.f32 %v747_v42, %v2674_v28  ;;  %v751_v45 = vadd.f32 %v747_v42, %v672_v40 }
 0x69d   :  { %v2188_v44 = vpop.f32.mrf.mxu1 }
 0x69e   :  { %762 = vrot.lane.b32.xlu1 %v760_v43, %s2475_s8  ;;  %v752_v46 = vadd.f32 %v2722_v35, %v751_v45 }
 0x6a0   :  { %v1933_v48 = vmul.f32 -1.442695, %v752_v46 }
 0x6a2   :  { %2387 = vpow2.f32 %v1933_v48 }
 0x6af   :  { %v2388_v49 = vpop.eup %2387 }
 0x6b0   :  { %v756_v50 = vadd.f32 1.0, %v2388_v49 }
 0x6b2   :  { %2389 = vrcp.f32 %v756_v50 }
 0x6bf   :  { %v2390_v51 = vpop.eup %2389 }
 0x6c0   :  { %v772_v60 = vsub.f32 1.0, %v2390_v51  ;;  %v778_v62 = vmul.f32 %v2390_v51, %v2776_v36 }
 0x710   :  { %v763_v52 = vpop.permute.xlu1 %762 }
 0x711   :  { %v765_v53 = vmul.f32 %v2390_v51, %v763_v52 }
 0x713   :  { %767 = vrot.lane.b32.xlu1 %v765_v53, %s2475_s8 }
 0x785   :  { %v768_v57 = vpop.permute.xlu1 %767 }
 0x786   :  { %v770_v58 = vadd.f32 %v768_v57, %v759_v55 }
 0x788   :  { %2391 = vtanh.f32 %v770_v58 }
 0x795   :  { %v2392_v59 = vpop.eup %2391 }
 0x796   :  { %774 = vrot.lane.b32.xlu0 %v2392_v59, %s2477_s6 }
 0x79a   :  { %788 = vperm.xlu0 %2368, %v2588_v8  }
 0x79e   :  { %2369 = vset.pattern.permute.xlu0 %v2480_v34 }
 0x808   :  { %v775_v61 = vpop.permute.xlu0 %774 }
 0x809   :  { %v777_v63 = vmul.f32 %v775_v61, %v772_v60 }
 0x80b   :  { %v2820_v0 = vadd.f32 %v778_v62, %v777_v63 }
 0x80d   :  { %867 = vrot.lane.b32.xlu1 %v2820_v0, %s2477_s6 }
 0x815   :  { %v789_v1 = vpop.permute.xlu0 %788 }
 0x816   :  { %vm790_vm7 = vcmp.eq.s32.totalorder %v2681_v31, %v789_v1  ;;  %v2481_v1 = vmov 5  }
 0x817   :  { %v1934_v2 = vsel %vm790_vm7, 1.0, %v2473_v7 }
 0x818   :  { %2206 = vmatmul.mubr.msk.f32.vlgmr.msra.gmra.mxu1 %vm201_vm3, %v1934_v2 }
 0x819   :  { %2239 = vmatpush3.msra.mxu1 %v2582_v6  ;;  %2246 = vmatprep.mubr.msk.f32.mxu1 %vm2474_vm1, %v2473_v7 }
 0x81a   :  { %2240 = vmatprep.subr.mxu1 %v2473_v7 }
 0x81b   :  { %2241 = vmatpush3.msra.mxu1 %v2597_v9 }
 0x81c   :  { %2242 = vmatprep.subr.mxu1 %v2473_v7 }
 0x81d   :  { %2243 = vmatpush3.msra.mxu1 %v2612_v12 }
 0x81e   :  { %2244 = vmatprep.subr.mxu1 %v2473_v7 }
 0x81f   :  { %2245 = vmatpush3.msra.mxu1 %v2623_v14 }
 0x820   :  { %2249 = vmatprep.subr.mxu1 %v2473_v7 }
 0x87f   :  { %v868_v3 = vpop.permute.xlu1 %867 }
 0x880   :  { %2217 = vmatmul.mubr.msk.f32.vlgmr.msra.gmra.mxu0 %vm275_vm5, %v868_v3 }
 0x881   :  { %2220 = vmatpush3.msra.mxu0 %v2668_v25  ;;  %2235 = vmatprep.mubr.msk.f32.mxu0 %vm2474_vm1, %v2473_v7 }
 0x882   :  { %2221 = vmatprep.subr.mxu0 %v2473_v7 }
 0x883   :  { %2222 = vmatpush3.msra.mxu0 %v2671_v26 }
 0x884   :  { %2223 = vmatprep.subr.mxu0 %v2473_v7 }
 0x885   :  { %2224 = vmatpush3.msra.mxu0 %v2664_v22 }
 0x886   :  { %2225 = vmatprep.subr.mxu0 %v2473_v7 }
 0x887   :  { %2226 = vmatpush3.msra.mxu0 %v2666_v23 }
 0x888   :  { %2227 = vmatprep.subr.mxu0 %v2473_v7 }
 0x889   :  { %2228 = vmatpush3.msra.mxu0 %v2660_v20 }
 0x88a   :  { %2229 = vmatprep.subr.mxu0 %v2473_v7 }
 0x88b   :  { %2230 = vmatpush3.msra.mxu0 %v2662_v21 }
 0x88c   :  { %2231 = vmatprep.subr.mxu0 %v2473_v7 }
 0x88d   :  { %2232 = vmatpush3.msra.mxu0 %v2656_v18 }
 0x88e   :  { %2233 = vmatprep.subr.mxu0 %v2473_v7 }
 0x88f   :  { %2234 = vmatpush3.msra.mxu0 %v2658_v19 }
 0x890   :  { %2268 = vmatprep.subr.mxu0 %v2473_v7 }
 0x8d8   :  { %v862_v5 = vpop.f32.mrf.mxu1 }
 0x8d9   :  { %v949_v37 = vadd.f32 %v862_v5, %v2726_v47 }
 0x8da   :  { %v2207_v10 = vpop.f32.mrf.mxu1 }
 0x940   :  { %v937_v11 = vpop.f32.mrf.mxu0 }
 0x941   :  { %v950_v13 = vadd.f32 %v937_v11, %v2674_v28  ;;  %v941_v16 = vadd.f32 %v937_v11, %v862_v5 }
 0x942   :  { %v2218_v15 = vpop.f32.mrf.mxu0 }
 0x943   :  { %952 = vrot.lane.b32.xlu1 %v950_v13, %s2475_s8  ;;  %v942_v17 = vadd.f32 %v2722_v35, %v941_v16 }
 0x945   :  { %v1937_v24 = vmul.f32 -1.442695, %v942_v17 }
 0x947   :  { %2393 = vpow2.f32 %v1937_v24 }
 0x954   :  { %v2394_v27 = vpop.eup %2393 }
 0x955   :  { %v946_v29 = vadd.f32 1.0, %v2394_v27 }
 0x957   :  { %2395 = vrcp.f32 %v946_v29 }
 0x964   :  { %v2396_v30 = vpop.eup %2395 }
 0x965   :  { %v962_v41 = vsub.f32 1.0, %v2396_v30  ;;  %v968_v43 = vmul.f32 %v2396_v30, %v2820_v0 }
 0x9b5   :  { %v953_v32 = vpop.permute.xlu1 %952 }
 0x9b6   :  { %v955_v33 = vmul.f32 %v2396_v30, %v953_v32 }
 0x9b8   :  { %957 = vrot.lane.b32.xlu1 %v955_v33, %s2475_s8 }
 0xa2a   :  { %v958_v38 = vpop.permute.xlu1 %957 }
 0xa2b   :  { %v960_v39 = vadd.f32 %v958_v38, %v949_v37 }
 0xa2d   :  { %2397 = vtanh.f32 %v960_v39 }
 0xa3a   :  { %v2398_v40 = vpop.eup %2397 }
 0xa3b   :  { %964 = vrot.lane.b32.xlu0 %v2398_v40, %s2477_s6 }
 0xa3f   :  { %978 = vperm.xlu0 %2369, %v2588_v8  }
 0xa43   :  { %2370 = vset.pattern.permute.xlu0 %v2481_v1 }
 0xaad   :  { %v965_v42 = vpop.permute.xlu0 %964 }
 0xaae   :  { %v967_v44 = vmul.f32 %v965_v42, %v962_v41 }
 0xab0   :  { %v2864_v45 = vadd.f32 %v968_v43, %v967_v44 }
 0xab2   :  { %1057 = vrot.lane.b32.xlu1 %v2864_v45, %s2477_s6 }
 0xaba   :  { %v979_v46 = vpop.permute.xlu0 %978 }
 0xabb   :  { %vm980_vm8 = vcmp.eq.s32.totalorder %v2681_v31, %v979_v46 }
 0xabc   :  { %v1938_v48 = vsel %vm980_vm8, 1.0, %v2473_v7 }
 0xabd   :  { %2236 = vmatmul.mubr.msk.f32.vlgmr.msra.gmra.mxu0 %vm201_vm3, %v1938_v48  ;;  %v2482_v48 = vmov 6  }
 0xabe   :  { %2269 = vmatpush3.msra.mxu0 %v2582_v6  ;;  %2276 = vmatprep.mubr.msk.f32.mxu0 %vm2474_vm1, %v2473_v7 }
 0xabf   :  { %2270 = vmatprep.subr.mxu0 %v2473_v7 }
 0xac0   :  { %2271 = vmatpush3.msra.mxu0 %v2597_v9 }
 0xac1   :  { %2272 = vmatprep.subr.mxu0 %v2473_v7 }
 0xac2   :  { %2273 = vmatpush3.msra.mxu0 %v2612_v12 }
 0xac3   :  { %2274 = vmatprep.subr.mxu0 %v2473_v7 }
 0xac4   :  { %2275 = vmatpush3.msra.mxu0 %v2623_v14 }
 0xac5   :  { %2279 = vmatprep.subr.mxu0 %v2473_v7 }
 0xb24   :  { %v1058_v49 = vpop.permute.xlu1 %1057 }
 0xb25   :  { %2247 = vmatmul.mubr.msk.f32.vlgmr.msra.gmra.mxu1 %vm275_vm5, %v1058_v49 }
 0xb26   :  { %2250 = vmatpush3.msra.mxu1 %v2668_v25  ;;  %2265 = vmatprep.mubr.msk.f32.mxu1 %vm2474_vm1, %v2473_v7 }
 0xb27   :  { %2251 = vmatprep.subr.mxu1 %v2473_v7 }
 0xb28   :  { %2252 = vmatpush3.msra.mxu1 %v2671_v26 }
 0xb29   :  { %2253 = vmatprep.subr.mxu1 %v2473_v7 }
 0xb2a   :  { %2254 = vmatpush3.msra.mxu1 %v2664_v22 }
 0xb2b   :  { %2255 = vmatprep.subr.mxu1 %v2473_v7 }
 0xb2c   :  { %2256 = vmatpush3.msra.mxu1 %v2666_v23 }
 0xb2d   :  { %2257 = vmatprep.subr.mxu1 %v2473_v7 }
 0xb2e   :  { %2258 = vmatpush3.msra.mxu1 %v2660_v20 }
 0xb2f   :  { %2259 = vmatprep.subr.mxu1 %v2473_v7 }
 0xb30   :  { %2260 = vmatpush3.msra.mxu1 %v2662_v21 }
 0xb31   :  { %2261 = vmatprep.subr.mxu1 %v2473_v7 }
 0xb32   :  { %2262 = vmatpush3.msra.mxu1 %v2656_v18 }
 0xb33   :  { %2263 = vmatprep.subr.mxu1 %v2473_v7 }
 0xb34   :  { %2264 = vmatpush3.msra.mxu1 %v2658_v19 }
 0xb35   :  { %2298 = vmatprep.subr.mxu1 %v2473_v7 }
 0xb7d   :  { %v1052_v50 = vpop.f32.mrf.mxu0 }
 0xb7e   :  { %v1139_v2 = vadd.f32 %v1052_v50, %v2726_v47 }
 0xb7f   :  { %v2237_v51 = vpop.f32.mrf.mxu0 }
 0xbe5   :  { %v1127_v52 = vpop.f32.mrf.mxu1 }
 0xbe6   :  { %v1140_v53 = vadd.f32 %v1127_v52, %v2674_v28  ;;  %v1131_v55 = vadd.f32 %v1127_v52, %v1052_v50 }
 0xbe7   :  { %v2248_v54 = vpop.f32.mrf.mxu1 }
 0xbe8   :  { %1142 = vrot.lane.b32.xlu1 %v1140_v53, %s2475_s8  ;;  %v1132_v57 = vadd.f32 %v2722_v35, %v1131_v55 }
 0xbea   :  { %v1941_v58 = vmul.f32 -1.442695, %v1132_v57 }
 0xbec   :  { %2399 = vpow2.f32 %v1941_v58 }
 0xbf9   :  { %v2400_v59 = vpop.eup %2399 }
 0xbfa   :  { %v1136_v60 = vadd.f32 1.0, %v2400_v59 }
 0xbfc   :  { %2401 = vrcp.f32 %v1136_v60 }
 0xc09   :  { %v2402_v61 = vpop.eup %2401 }
 0xc0a   :  { %v1152_v11 = vsub.f32 1.0, %v2402_v61  ;;  %v1158_v15 = vmul.f32 %v2402_v61, %v2864_v45 }
 0xc5a   :  { %v1143_v62 = vpop.permute.xlu1 %1142 }
 0xc5b   :  { %v1145_v63 = vmul.f32 %v2402_v61, %v1143_v62 }
 0xc5d   :  { %1147 = vrot.lane.b32.xlu1 %v1145_v63, %s2475_s8 }
 0xccf   :  { %v1148_v3 = vpop.permute.xlu1 %1147 }
 0xcd0   :  { %v1150_v5 = vadd.f32 %v1148_v3, %v1139_v2 }
 0xcd2   :  { %2403 = vtanh.f32 %v1150_v5 }
 0xcdf   :  { %v2404_v10 = vpop.eup %2403 }
 0xce0   :  { %1154 = vrot.lane.b32.xlu0 %v2404_v10, %s2477_s6  ;;  %v2996_v10 = vld [vmem:[%s3090_s1] sm:$0x3] }
 0xce1   :  { %vm400_vm11 = vcmp.eq.s32.totalorder %v2996_v10, 0  ;;  %vm970_vm13 = vcmp.eq.s32.totalorder %v2996_v10, 3  ;;  %vm1350_vm14 = vcmp.eq.s32.totalorder %v2996_v10, 5  ;;  %vm1730_vm15 = vcmp.eq.s32.totalorder %v2996_v10, 7 }
 0xce2   :  { %vm590_vm0 = vcmp.eq.s32.totalorder %v2996_v10, 1  ;;  %vm1160_vm2 = vcmp.eq.s32.totalorder %v2996_v10, 4 }
 0xce4   :  { %1168 = vperm.xlu0 %2370, %v2588_v8  }
 0xce8   :  { %2371 = vset.pattern.permute.xlu0 %v2482_v48 }
 0xd52   :  { %v1155_v13 = vpop.permute.xlu0 %1154 }
 0xd53   :  { %v1157_v16 = vmul.f32 %v1155_v13, %v1152_v11  ;;  %v401_v11 = vsel %vm400_vm11, 1, %v2472_v4 }
 0xd55   :  { %v2908_v17 = vadd.f32 %v1158_v15, %v1157_v16 }
 0xd57   :  { %1247 = vrot.lane.b32.xlu1 %v2908_v17, %s2477_s6 }
 0xd5f   :  { %v1169_v24 = vpop.permute.xlu0 %1168 }
 0xd60   :  { %vm1170_vm9 = vcmp.eq.s32.totalorder %v2681_v31, %v1169_v24 }
 0xd61   :  { %v1942_v27 = vsel %vm1170_vm9, 1.0, %v2473_v7 }
 0xd62   :  { %2266 = vmatmul.mubr.msk.f32.vlgmr.msra.gmra.mxu1 %vm201_vm3, %v1942_v27 }
 0xd63   :  { %2299 = vmatpush3.msra.mxu1 %v2582_v6  ;;  %2306 = vmatprep.mubr.msk.f32.mxu1 %vm2474_vm1, %v2473_v7 }
 0xd64   :  { %2300 = vmatprep.subr.mxu1 %v2473_v7 }
 0xd65   :  { %2301 = vmatpush3.msra.mxu1 %v2597_v9 }
 0xd66   :  { %2302 = vmatprep.subr.mxu1 %v2473_v7 }
 0xd67   :  { %2303 = vmatpush3.msra.mxu1 %v2612_v12 }
 0xd68   :  { %2304 = vmatprep.subr.mxu1 %v2473_v7 }
 0xd69   :  { %2305 = vmatpush3.msra.mxu1 %v2623_v14 }
 0xd6a   :  { %2309 = vmatprep.subr.mxu1 %v2473_v7 }
 0xdc9   :  { %v1248_v29 = vpop.permute.xlu1 %1247 }
 0xdca   :  { %2277 = vmatmul.mubr.msk.f32.vlgmr.msra.gmra.mxu0 %vm275_vm5, %v1248_v29 }
 0xdcb   :  { %2280 = vmatpush3.msra.mxu0 %v2668_v25  ;;  %2295 = vmatprep.mubr.msk.f32.mxu0 %vm2474_vm1, %v2473_v7 }
 0xdcc   :  { %2281 = vmatprep.subr.mxu0 %v2473_v7 }
 0xdcd   :  { %2282 = vmatpush3.msra.mxu0 %v2671_v26 }
 0xdce   :  { %2283 = vmatprep.subr.mxu0 %v2473_v7 }
 0xdcf   :  { %2284 = vmatpush3.msra.mxu0 %v2664_v22 }
 0xdd0   :  { %2285 = vmatprep.subr.mxu0 %v2473_v7 }
 0xdd1   :  { %2286 = vmatpush3.msra.mxu0 %v2666_v23 }
 0xdd2   :  { %2287 = vmatprep.subr.mxu0 %v2473_v7 }
 0xdd3   :  { %2288 = vmatpush3.msra.mxu0 %v2660_v20 }
 0xdd4   :  { %2289 = vmatprep.subr.mxu0 %v2473_v7 }
 0xdd5   :  { %2290 = vmatpush3.msra.mxu0 %v2662_v21 }
 0xdd6   :  { %2291 = vmatprep.subr.mxu0 %v2473_v7 }
 0xdd7   :  { %2292 = vmatpush3.msra.mxu0 %v2656_v18 }
 0xdd8   :  { %2293 = vmatprep.subr.mxu0 %v2473_v7 }
 0xdd9   :  { %2294 = vmatpush3.msra.mxu0 %v2658_v19 }
 0xdda   :  { %2328 = vmatprep.subr.mxu0 %v2473_v7 }
 0xe22   :  { %v1242_v30 = vpop.f32.mrf.mxu1 }
 0xe23   :  { %v1329_v49 = vadd.f32 %v1242_v30, %v2726_v47 }
 0xe24   :  { %v2267_v32 = vpop.f32.mrf.mxu1 }
 0xe8a   :  { %v1317_v33 = vpop.f32.mrf.mxu0 }
 0xe8b   :  { %v1330_v34 = vadd.f32 %v1317_v33, %v2674_v28  ;;  %v1321_v38 = vadd.f32 %v1317_v33, %v1242_v30 }
 0xe8c   :  { %v2278_v37 = vpop.f32.mrf.mxu0 }
 0xe8d   :  { %1332 = vrot.lane.b32.xlu1 %v1330_v34, %s2475_s8  ;;  %v1322_v39 = vadd.f32 %v2722_v35, %v1321_v38  ;;  %v971_v38 = vsel %vm970_vm13, 1, %v2472_v4  ;;  %vm1824_vm13 = vcmask 1041408  }
 0xe8f   :  { %v1945_v40 = vmul.f32 -1.442695, %v1322_v39 }
 0xe91   :  { %2405 = vpow2.f32 %v1945_v40  ;;  %v1351_v40 = vsel %vm1350_vm14, 1, %v2472_v4 }
 0xe9e   :  { %v2406_v41 = vpop.eup %2405 }
 0xe9f   :  { %v1326_v42 = vadd.f32 1.0, %v2406_v41  ;;  %v1731_v41 = vsel %vm1730_vm15, 1, %v2472_v4 }
 0xea1   :  { %2407 = vrcp.f32 %v1326_v42 }
 0xeae   :  { %v2408_v43 = vpop.eup %2407 }
 0xeaf   :  { %v1342_v53 = vsub.f32 1.0, %v2408_v43  ;;  %v1348_v55 = vmul.f32 %v2408_v43, %v2908_v17 }
 0xeff   :  { %v1333_v44 = vpop.permute.xlu1 %1332 }
 0xf00   :  { %v1335_v46 = vmul.f32 %v2408_v43, %v1333_v44 }
 0xf02   :  { %1337 = vrot.lane.b32.xlu1 %v1335_v46, %s2475_s8 }
 0xf74   :  { %v1338_v50 = vpop.permute.xlu1 %1337 }
 0xf75   :  { %v1340_v51 = vadd.f32 %v1338_v50, %v1329_v49 }
 0xf77   :  { %2409 = vtanh.f32 %v1340_v51  ;;  %v591_v51 = vsel %vm590_vm0, 1, %v2472_v4  ;;  %vm1839_vm0 = vcmask 1024  }
 0xf84   :  { %v2410_v52 = vpop.eup %2409 }
 0xf85   :  { %1344 = vrot.lane.b32.xlu0 %v2410_v52, %s2477_s6 }
 0xf89   :  { %1358 = vperm.xlu0 %2371, %v2588_v8  }
 0xff7   :  { %v1345_v54 = vpop.permute.xlu0 %1344 }
 0xff8   :  { %v1347_v57 = vmul.f32 %v1345_v54, %v1342_v53 }
 0xffa   :  { %v2952_v58 = vadd.f32 %v1348_v55, %v1347_v57 }
 0xffc   :  { %1437 = vrot.lane.b32.xlu1 %v2952_v58, %s2477_s6 }
0x1004   :  { %v1359_v59 = vpop.permute.xlu0 %1358 }
0x1005   :  { %vm1360_vm10 = vcmp.eq.s32.totalorder %v2681_v31, %v1359_v59  ;;  %v1740_v59 = vld [vmem:[%s3098_s9 + $0x18] sm:$0xff] }
0x1006   :  { %v1946_v60 = vsel %vm1360_vm10, 1.0, %v2473_v7 }
0x1007   :  { %2296 = vmatmul.mubr.msk.f32.vlgmr.msra.gmra.mxu0 %vm201_vm3, %v1946_v60  ;;  %v1739_v60 = vld [vmem:[%s3098_s9 + $0x10] sm:$0xff] }
0x1008   :  { %2329 = vmatpush3.msra.mxu0 %v2582_v6  ;;  %2336 = vmatprep.mubr.msk.f32.mxu0 %vm2474_vm1, %v2473_v7 }
0x1009   :  { %2330 = vmatprep.subr.mxu0 %v2473_v7 }
0x100a   :  { %2331 = vmatpush3.msra.mxu0 %v2597_v9 }
0x100b   :  { %2332 = vmatprep.subr.mxu0 %v2473_v7 }
0x100c   :  { %2333 = vmatpush3.msra.mxu0 %v2612_v12 }
0x100d   :  { %2334 = vmatprep.subr.mxu0 %v2473_v7 }
0x100e   :  { %2335 = vmatpush3.msra.mxu0 %v2623_v14 }
0x100f   :  { %2339 = vmatprep.subr.mxu0 %v2473_v7 }
0x106e   :  { %v1438_v61 = vpop.permute.xlu1 %1437 }
0x106f   :  { %2307 = vmatmul.mubr.msk.f32.vlgmr.msra.gmra.mxu1 %vm275_vm5, %v1438_v61 }
0x1070   :  { %2310 = vmatpush3.msra.mxu1 %v2668_v25  ;;  %2325 = vmatprep.mubr.msk.f32.mxu1 %vm2474_vm1, %v2473_v7 }
0x1071   :  { %2311 = vmatprep.subr.mxu1 %v2473_v7 }
0x1072   :  { %2312 = vmatpush3.msra.mxu1 %v2671_v26 }
0x1073   :  { %2313 = vmatprep.subr.mxu1 %v2473_v7 }
0x1074   :  { %2314 = vmatpush3.msra.mxu1 %v2664_v22 }
0x1075   :  { %2315 = vmatprep.subr.mxu1 %v2473_v7 }
0x1076   :  { %2316 = vmatpush3.msra.mxu1 %v2666_v23 }
0x1077   :  { %2317 = vmatprep.subr.mxu1 %v2473_v7 }
0x1078   :  { %2318 = vmatpush3.msra.mxu1 %v2660_v20 }
0x1079   :  { %2319 = vmatprep.subr.mxu1 %v2473_v7 }
0x107a   :  { %2320 = vmatpush3.msra.mxu1 %v2662_v21 }
0x107b   :  { %2321 = vmatprep.subr.mxu1 %v2473_v7 }
0x107c   :  { %2322 = vmatpush3.msra.mxu1 %v2656_v18 }
0x107d   :  { %2323 = vmatprep.subr.mxu1 %v2473_v7 }
0x107e   :  { %2324 = vmatpush3.msra.mxu1 %v2658_v19  ;;  %v2483_v19 = vmov 7  }
0x107f   :  { %2372 = vset.pattern.permute.xlu0 %v2483_v19 }
0x10c7   :  { %v1432_v6 = vpop.f32.mrf.mxu0 }
0x10c8   :  { %v1519_v1 = vadd.f32 %v1432_v6, %v2726_v47 }
0x10c9   :  { %v2297_v9 = vpop.f32.mrf.mxu0 }
0x112f   :  { %v1507_v12 = vpop.f32.mrf.mxu1 }
0x1130   :  { %v1520_v14 = vadd.f32 %v1507_v12, %v2674_v28  ;;  %v1511_v20 = vadd.f32 %v1507_v12, %v1432_v6 }
0x1131   :  { %v2308_v22 = vpop.f32.mrf.mxu1 }
0x1132   :  { %1522 = vrot.lane.b32.xlu1 %v1520_v14, %s2475_s8  ;;  %v1512_v23 = vadd.f32 %v2722_v35, %v1511_v20 }
0x1134   :  { %v1949_v21 = vmul.f32 -1.442695, %v1512_v23 }
0x1136   :  { %2411 = vpow2.f32 %v1949_v21 }
0x1143   :  { %v2412_v25 = vpop.eup %2411 }
0x1144   :  { %v1516_v26 = vadd.f32 1.0, %v2412_v25 }
0x1146   :  { %2413 = vrcp.f32 %v1516_v26 }
0x1153   :  { %v2414_v18 = vpop.eup %2413 }
0x1154   :  { %v1532_v13 = vsub.f32 1.0, %v2414_v18  ;;  %v1538_v16 = vmul.f32 %v2414_v18, %v2952_v58 }
0x11a4   :  { %v1523_v62 = vpop.permute.xlu1 %1522 }
0x11a5   :  { %v1525_v63 = vmul.f32 %v2414_v18, %v1523_v62 }
0x11a7   :  { %1527 = vrot.lane.b32.xlu1 %v1525_v63, %s2475_s8 }
0x1219   :  { %v1528_v2 = vpop.permute.xlu1 %1527 }
0x121a   :  { %v1530_v3 = vadd.f32 %v1528_v2, %v1519_v1 }
0x121c   :  { %2415 = vtanh.f32 %v1530_v3 }
0x1229   :  { %v2416_v5 = vpop.eup %2415 }
0x122a   :  { %1534 = vrot.lane.b32.xlu0 %v2416_v5, %s2477_s6 }
0x122e   :  { %1548 = vperm.xlu0 %2372, %v2588_v8  }
0x1232   :  { %2373 = vset.pattern.permute.xlu0 %v2472_v4 }
0x1233   :  { %403 = vperm.xlu0 %2373, %v401_v11  }
0x1237   :  { %973 = vperm.xlu0 %2373, %v971_v38  }
0x123b   :  { %1353 = vperm.xlu0 %2373, %v1351_v40  }
0x123f   :  { %1733 = vperm.xlu0 %2373, %v1731_v41  }
0x129c   :  { %v1535_v15 = vpop.permute.xlu0 %1534 }
0x129d   :  { %v1537_v24 = vmul.f32 %v1535_v15, %v1532_v13 }
0x129f   :  { %v3003_v27 = vadd.f32 %v1538_v16, %v1537_v24 }
0x12a1   :  { %1627 = vrot.lane.b32.xlu1 %v3003_v27, %s2477_s6 }
0x12a9   :  { %v1549_v29 = vpop.permute.xlu0 %1548 }
0x12aa   :  { %vm1550_vm12 = vcmp.eq.s32.totalorder %v2681_v31, %v1549_v29 }
0x12ab   :  { %v1950_v8 = vsel %vm1550_vm12, 1.0, %v2473_v7 }
0x12ac   :  { %2326 = vmatmul.mubr.msk.f32.vlgmr.msra.gmra.mxu1 %vm201_vm3, %v1950_v8  ;;  %vm1540_vm3 = vcmp.eq.s32.totalorder %v2996_v10, 6 }
0x12ad   :  { %v1541_v53 = vsel %vm1540_vm3, 1, %v2472_v4 }
0x12ae   :  { %v404_v12 = vpop.permute.xlu0 %403 }
0x12af   :  { %vm405_vm4 = vcmp.eq.s32.totalorder %v404_v12, 1 }
0x12b0   :  { %v406_v20 = vsel %vm405_vm4, %v2732_v56, 0.0 }
0x12b2   :  { %v974_v22 = vpop.permute.xlu0 %973 }
0x12b3   :  { %vm975_vm8 = vcmp.eq.s32.totalorder %v974_v22, 1 }
0x12b6   :  { %v1354_v25 = vpop.permute.xlu0 %1353 }
0x12b7   :  { %vm1355_vm10 = vcmp.eq.s32.totalorder %v1354_v25, 1 }
0x12ba   :  { %v1734_v19 = vpop.permute.xlu0 %1733 }
0x12bb   :  { %vm1735_vm12 = vcmp.eq.s32.totalorder %v1734_v19, 1 }
0x1313   :  { %v1628_v30 = vpop.permute.xlu1 %1627 }
0x1314   :  { %2337 = vmatmul.mubr.msk.f32.vlgmr.msra.gmra.mxu0 %vm275_vm5, %v1628_v30 }
0x1315   :  { %2347 = vmatprep.mubr.msk.f32.mxu0 %vm2474_vm1, %v2473_v7  ;;  %vm780_vm1 = vcmp.eq.s32.totalorder %v2996_v10, 2  ;;  %2340 = vmatpush3.msra.mxu0 %v1740_v59 }
0x1316   :  { %v781_v52 = vsel %vm780_vm1, 1, %v2472_v4  ;;  %2341 = vmatprep.subr.mxu0 %v2473_v7 }
0x1317   :  { %2342 = vmatpush3.msra.mxu0 %v1739_v60 }
0x1318   :  { %2343 = vmatprep.subr.mxu0 %v2473_v7 }
0x136c   :  { %v1622_v32 = vpop.f32.mrf.mxu1 }
0x136d   :  { %v1709_v54 = vadd.f32 %v1622_v32, %v2726_v47  ;;  %v1737_v47 = vld [vmem:[%s3098_s9] sm:$0xff] }
0x136e   :  { %v2327_v33 = vpop.f32.mrf.mxu1 }
0x13d4   :  { %v1697_v34 = vpop.f32.mrf.mxu0 }
0x13d5   :  { %v1710_v37 = vadd.f32 %v1697_v34, %v2674_v28  ;;  %v1701_v42 = vadd.f32 %v1697_v34, %v1622_v32 }
0x13d6   :  { %v2338_v39 = vpop.f32.mrf.mxu0 }
0x13d7   :  { %1712 = vrot.lane.b32.xlu1 %v1710_v37, %s2475_s8  ;;  %v1702_v43 = vadd.f32 %v2722_v35, %v1701_v42  ;;  %v1161_v35 = vsel %vm1160_vm2, 1, %v2472_v4  ;;  %v1738_v4 = vld [vmem:[%s3098_s9 + $0x8] sm:$0xff] }
0x13d8   :  { %2344 = vmatpush3.msra.mxu0 %v1738_v4 }
0x13d9   :  { %v1953_v28 = vmul.f32 -1.442695, %v1702_v43  ;;  %2345 = vmatprep.subr.mxu0 %v2473_v7 }
0x13da   :  { %2346 = vmatpush3.msra.mxu0 %v1737_v47 }
0x13db   :  { %2417 = vpow2.f32 %v1953_v28  ;;  %v1871_v28 = vld [vmem:[%s3091_s2] sm:$0x3] }
0x13dc   :  { %vm1872_vm15 = vcmp.lt.s32.totalorder %v1871_v28, 8 }
0x13e8   :  { %v2418_v44 = vpop.eup %2417 }
0x13e9   :  { %v1706_v46 = vadd.f32 1.0, %v2418_v44  ;;  %v1873_v44 = vadd.s32 1, %v1871_v28 }
0x13eb   :  { %2419 = vrcp.f32 %v1706_v46  ;;  %v1874_v46 = vsel %vm1872_vm15, %v1873_v44, %v1871_v28 }
0x13ec   :  { %1875 = vst.msk [vmem:[%s3103_s14] sm:$0x3] %vm1839_vm0, %v1874_v46 }
0x13f8   :  { %v2420_v48 = vpop.eup %2419 }
0x13f9   :  { %v1722_v18 = vsub.f32 1.0, %v2420_v48  ;;  %v1728_v1 = vmul.f32 %v2420_v48, %v3003_v27 }
0x1449   :  { %v1713_v49 = vpop.permute.xlu1 %1712 }
0x144a   :  { %v1715_v50 = vmul.f32 %v2420_v48, %v1713_v49 }
0x144c   :  { %1717 = vrot.lane.b32.xlu1 %v1715_v50, %s2475_s8  ;;  %s1882_s8 = sshll.u32 %s2484_s24, 4  ;;  %s1883_s8 = int_to_ptr.vmem [resolvable:$true] %s1882_s8 }
0x144d   :  { %s2428_s5 = scalar_lea.vmem %s1883_s8, 32  ;;  %p2433_p1 = scmp.lt.s32.totalorder %s1883_s8, %s1883_s8 }
0x144e   :  { %p2429_p0 = scmp.ne.s32.totalorder %s1883_s8, %s2428_s5  ;;  %p2434_p2 = scmp.lt.s32.totalorder %s2428_s5, %s2428_s5 }
0x1450   :  { %593 = vperm.xlu1 %2374, %v591_v51   ;;  %p2435_p3 = por %p2434_p2, %p2433_p1 }
0x1452   :  { %p2436_p4 = pnand %p2435_p3, %p2429_p0 }
0x1454   :  { %783 = vperm.xlu1 %2374, %v781_v52  }
0x1458   :  { %1163 = vperm.xlu1 %2374, %v1161_v35  }
0x145c   :  { %1543 = vperm.xlu1 %2374, %v1541_v53  }
0x14be   :  { %v1718_v55 = vpop.permute.xlu1 %1717 }
0x14bf   :  { %v1720_v57 = vadd.f32 %v1718_v55, %v1709_v54 }
0x14c1   :  { %2421 = vtanh.f32 %v1720_v57 }
0x14cb   :  { %v594_v6 = vpop.permute.xlu1 %593 }
0x14cc   :  { %vm595_vm6 = vcmp.eq.s32.totalorder %v594_v6, 1 }
0x14cd   :  { %v596_v23 = vsel %vm595_vm6, %v2776_v36, %v406_v20 }
0x14ce   :  { %v2422_v61 = vpop.eup %2421 }
0x14cf   :  { %1724 = vrot.lane.b32.xlu1 %v2422_v61, %s2477_s6  ;;  %v784_v9 = vpop.permute.xlu1 %783 }
0x14d0   :  { %vm785_vm7 = vcmp.eq.s32.totalorder %v784_v9, 1 }
0x14d1   :  { %v786_v21 = vsel %vm785_vm7, %v2820_v0, %v596_v23 }
0x14d2   :  { %v976_v26 = vsel %vm975_vm8, %v2864_v45, %v786_v21 }
0x14d3   :  { %v1164_v14 = vpop.permute.xlu1 %1163 }
0x14d4   :  { %vm1165_vm9 = vcmp.eq.s32.totalorder %v1164_v14, 1 }
0x14d5   :  { %v1166_v62 = vsel %vm1165_vm9, %v2908_v17, %v976_v26  ;;  %v1954_v17 = vld [vmem:[%s3099_s10] ss:$0 sm:$0xff] }
0x14d6   :  { %v1356_v36 = vsel %vm1355_vm10, %v2952_v58, %v1166_v62 }
0x14d7   :  { %v1544_v7 = vpop.permute.xlu1 %1543 }
0x14d8   :  { %vm1545_vm11 = vcmp.eq.s32.totalorder %v1544_v7, 1 }
0x14d9   :  { %v1546_v0 = vsel %vm1545_vm11, %v3003_v27, %v1356_v36 }
0x1541   :  { %v1725_v63 = vpop.permute.xlu1 %1724 }
0x1542   :  { %v1727_v56 = vmul.f32 %v1725_v63, %v1722_v18 }
0x1544   :  { %v1729_v2 = vadd.f32 %v1728_v1, %v1727_v56 }
0x1546   :  { %v1736_v3 = vsel %vm1735_vm12, %v1729_v2, %v1546_v0 }
0x1547   :  { %1749 = vrot.lane.b32.xlu0 %v1736_v3, %s2477_s6 }
0x15b9   :  { %v1750_v45 = vpop.permute.xlu0 %1749 }
0x15ba   :  { %2348 = vmatmul.mubr.msk.f32.vlgmr.msra.gmra.mxu0 %vm275_vm5, %v1750_v45 }
0x167a   :  { %v1819_v5 = vpop.f32.mrf.mxu0 }
0x167b   :  { %v1820_v11 = vadd.f32 %v1954_v17, %v1819_v5 }
0x167c   :  { %v2349_v13 = vpop.f32.mrf.mxu0 }
0x167d   :  { %1823 = vst [vmem:[#allocation2] sm:$0x3] %v1820_v11  ;;  %v1825_v58 = vsel %vm1824_vm13, %v1820_v11, -inf }
0x167e   :  { %1826 = vmax.xlane.f32.xlu1 %v1825_v58 }
0x1707   :  { %v1827_v15 = vpop.xlane.xlu1 %1826 }
0x1708   :  { %v1828_v16 = vsub.f32 %v1820_v11, %v1827_v15  ;;  %vm1841_vm14 = vcmp.ge.f32.partialorder %v1820_v11, %v1827_v15 }
0x1709   :  { %v1842_v27 = vsel %vm1841_vm14, %v2681_v31, 128 }
0x170a   :  { %v1829_v24 = vmul.f32 1.442695, %v1828_v16  ;;  %v1843_v29 = vsel %vm1824_vm13, %v1842_v27, 2147483647 }
0x170b   :  { %v1845_v30 = vshra.s32 %v1843_v29, 16  ;;  %v1844_v37 = vand.u32 65535, %v1843_v29 }
0x170c   :  { %2423 = vpow2.f32 %v1829_v24 }
0x170d   :  { %v1847_v33 = vcvt.s32.f32 %v1845_v30  ;;  %v1846_v39 = vcvt.s32.f32 %v1844_v37 }
0x1719   :  { %v2424_v8 = vpop.eup %2423 }
0x171a   :  { %v1831_v32 = vsel %vm1824_vm13, %v2424_v8, 0.0 }
0x171b   :  { %1832 = vadd.xlane.f32.xlu0 %v1831_v32 }
0x171f   :  { %1848 = vmin.xlane.f32.xlu0 %v1847_v33 }
0x17a4   :  { %v1833_v34 = vpop.xlane.xlu0 %1832 }
0x17a5   :  { %2425 = vrcp.f32 %v1833_v34 }
0x17a8   :  { %v1849_v38 = vpop.xlane.xlu0 %1848 }
0x17a9   :  { %vm1850_vm5 = vcmp.eq.f32.partialorder %v1847_v33, %v1849_v38 }
0x17aa   :  { %v1851_v40 = vsel %vm1850_vm5, %v1846_v39, inf }
0x17ab   :  { %1852 = vmin.xlane.f32.xlu1 %v1851_v40 }
0x17b2   :  { %v2426_v41 = vpop.eup %2425 }
0x17b3   :  { %v1835_v42 = vmul.f32 %v2426_v41, %v2424_v8 }
0x17b5   :  { %v1836_v43 = vsel %vm1824_vm13, %v1835_v42, -inf }
0x17b6   :  { %1837 = vmax.xlane.f32.xlu0 %v1836_v43 }
0x17bc   :  { %1863 = vperm.xlu1 %2374, %v2996_v10  }
0x17bd   :  { %2439 = shalt.err (!%p2436_p4)
}
0x17be   :  { %1885 = dma.vmem_to_hbm [thread:$0]  %s1883_s8, 32, %s3100_s11, [#allocation3]   ;;  %v2427_v10 = vld [vmem:[%s3089_s0] sm:$0x3]  ;;  %v1855_v49 = vcvt.f32.s32 %v1849_v38  ;;  %vm1860_vm1 = vcmask 7168   ;;  %vm1869_vm3 = vcmask 58368  }
0x17bf   :  { %s2485_s7 = smov 1   ;;  %s2486_s6 = smov [#allocation4]  }
0x17c0   :  { %v1856_v52 = vshll.u32 %v1855_v49, 16  ;;  %s1894_s11 = sshll.u32 %s2486_s6, 4  ;;  %s1895_s11 = int_to_ptr.vmem [resolvable:$true] %s1894_s11 }
0x17c1   :  { %s2448_s0 = scalar_lea.vmem %s1895_s11, 32  ;;  %p2453_p6 = scmp.lt.s32.totalorder %s1895_s11, %s1895_s11 }
0x17c2   :  { %p2449_p5 = scmp.ne.s32.totalorder %s1895_s11, %s2448_s0  ;;  %p2454_p7 = scmp.lt.s32.totalorder %s2448_s0, %s2448_s0 }
0x17c4   :  { %p2455_p8 = por %p2454_p7, %p2453_p6 }
0x17c6   :  { %p2456_p9 = pnand %p2455_p8, %p2449_p5 }
0x17cc   :  { %1858 = vrot.lane.b32.xlu0 %v2427_v10, %s2485_s7 }
0x1834   :  { %v1853_v48 = vpop.xlane.xlu1 %1852 }
0x1835   :  { %v1854_v50 = vcvt.f32.s32 %v1853_v48 }
0x1837   :  { %v1857_v53 = vadd.s32 %v1856_v52, %v1854_v50 }
0x1838   :  { %v1864_v35 = vpop.permute.xlu1 %1863 }
0x1839   :  { %vm1866_vm2 = vcmp.eq.s32.totalorder %v2681_v31, %v1864_v35  ;;  %vm1865_vm4 = vcmp.lt.s32.totalorder %v2681_v31, %v1864_v35 }
0x183f   :  { %v1838_v51 = vpop.xlane.xlu0 %1837 }
0x1840   :  { %1840 = vst.msk [vmem:[%s3101_s12] sm:$0x3] %vm1839_vm0, %v1838_v51 }
0x1843   :  { %v1859_v54 = vpop.permute.xlu0 %1858 }
0x1844   :  { %v1861_v55 = vsel %vm1860_vm1, %v2427_v10, %v1859_v54 }
0x1845   :  { %v1867_v57 = vsel %vm1866_vm2, %v1857_v53, %v1861_v55 }
0x1846   :  { %v1868_v59 = vsel %vm1865_vm4, %v2427_v10, %v1867_v57 }
0x1847   :  { %1870 = vst.msk [vmem:[#allocation4] sm:$0x3] %vm1869_vm3, %v1868_v59 }
0x1848   :  { %2459 = shalt.err (!%p2456_p9)
}
0x1849   :  { %1897 = dma.vmem_to_hbm [thread:$0]  %s1895_s11, 32, %s3102_s13, [#allocation5]  }
0x184a   :  { %2468 = dma.done.wait [#allocation3], 32  }
0x184b   :  { %2469 = vsyncadd [#allocation3], 4294967264 }
0x184c   :  { %2470 = dma.done.wait [#allocation5], 32  }
0x184d   :  { %2471 = vsyncadd [#allocation5], 4294967264 }
0x184e   :  { %1910 = vsyncpa [#allocation3], 1 }
0x184f   :  { %1911 = vsyncpa [#allocation5], 1 }

</bundles_post_ra>
